<compile_context>
chip_gen: v7x
topology: tpu7x:2x2x1
jax: 0.10.0
libtpu: 0.0.40
codegen_flags: <defaults>
</compile_context>

<pallas_src>
import functools

import jax
import jax.numpy as jnp
from jax.experimental import pallas as pl
from jax.experimental.pallas import tpu as pltpu

# ----------------------------- ReLU-KAN constants -----------------------------
G = 5          # grid
KK = 3         # k (spline-ish order)
GK = G + KK    # number of basis functions per input feature (8)
R = 4.0 * G * G / ((KK + 1) * (KK + 1))   # 6.25


def _round_up(x, m):
    return ((x + m - 1) // m) * m


def _cdiv(a, b):
    return (a + b - 1) // b


# ----------------------------- Pallas kernel ----------------------------------
def relukan_kernel(x_ref, ph_ref, w_ref, b_ref, o_ref, y_ref, *, dp):
    """x: (Dp, TM) f32   ph: (GK*Dp, 2) f32 [lo | hi]   w: (Op, GK*Dp) bf16
       b: (Op, 1) f32    o: (Op, TM) f32                y: (GK*Dp, TM) bf16 scratch."""
    # Basis expansion (the VALU-bound part).  R^2 is folded into w, so each slab is
    # relu((x - lo) * (hi - x)) ** 2 which equals (relu(x - lo) * relu(hi - x)) ** 2 because
    # phase_high > phase_low elementwise -- one fewer max per element.
    for p in range(GK):                                     # static unroll, 16-row-aligned slabs
        x = x_ref[...]                                      # re-read per p: vld has slack; keeps
                                                            # the live range to one slab (no spills)
        ph = ph_ref[p * dp:(p + 1) * dp, :]                 # (Dp, 2)
        lo = ph[:, 0:1]                                     # (Dp, 1) -> lane broadcast
        hi = ph[:, 1:2]
        t = jnp.maximum((x - lo) * (hi - x), 0.0)
        y_ref[p * dp:(p + 1) * dp, :] = (t * t).astype(y_ref.dtype)
    # One fused contraction over K = GK*Dp (bf16 MXU pass, f32 accumulate); bias in the
    # epilogue.  Output (Op, TM) is lane-dense -> unmasked vst.
    acc = jnp.dot(w_ref[...], y_ref[...], preferred_element_type=jnp.float32)
    o_ref[...] = (acc + b_ref[...]).astype(o_ref.dtype)


# ----------------------------- VMEM budgeting ----------------------------------
def _vmem_budget_bytes():
    """~3/4 of physical VMEM: ~48 MiB on v7x (64 MiB), ~96 MiB on v5e/v6e (128 MiB)."""
    cap = None
    try:
        cap = getattr(pltpu.get_tpu_info(), "vmem_capacity_bytes", None)
    except Exception:
        cap = None
    if not cap:
        cap = 64 * 1024 * 1024            # conservative (v7x-sized) fallback
    return (3 * int(cap)) // 4


def _tile_footprint_bytes(dp, op, tm):
    return (2 * dp * tm * 4               # X block, f32, double-buffered
            + 2 * op * tm * 4             # out block, f32, double-buffered
            + GK * dp * tm * 2            # bf16 basis scratch (single)
            + op * GK * dp * 2            # bf16 packed weight (invariant)
            + GK * dp * 128 * 4           # phases, lane-padded to 128 (invariant)
            + op * 128 * 4)               # bias, lane-padded (invariant)


@functools.lru_cache(maxsize=None)
def _supports_buffered_invariants():
    """Feature-detect pipeline_mode=pl.Buffered(1) (single-buffer for invariant operands)."""
    def kern(a_ref, c_ref, o_ref):
        o_ref[...] = a_ref[...] + c_ref[...]
    try:
        f = pl.pallas_call(
            kern,
            out_shape=jax.ShapeDtypeStruct((8, 128), jnp.float32),
            grid=(1,),
            in_specs=[
                pl.BlockSpec((8, 128), lambda i: (0, 0)),
                pl.BlockSpec((8, 128), lambda i: (0, 0), pipeline_mode=pl.Buffered(1)),
            ],
            out_specs=pl.BlockSpec((8, 128), lambda i: (0, 0)),
        )
        jax.block_until_ready(f(jnp.zeros((8, 128), jnp.float32),
                                jnp.ones((8, 128), jnp.float32)))
        return True
    except Exception:
        return False


# ----------------------------- wrapper -----------------------------------------
def relukan_dense_t(xu, phase_low, phase_high, w_conv, b_conv, tm_max=1024):
    """Apply ReLUKANLayer to patch columns: xu (B, D, L) -> (B, O, L) via Pallas."""
    bsz, d, l = xu.shape
    o = w_conv.shape[0]
    dp = _round_up(d, 16)                 # 16-row multiple: bf16 slab starts stay sublane-packed
    op = _round_up(o, 8)

    # Lane tile over patches: balance tiles (padded tail < 128), shrink to the per-chip VMEM
    # budget, keep TM a multiple of 128, and make sure v7x's 2nd TensorCore has work.
    budget = _vmem_budget_bytes()
    tm = _round_up(_cdiv(l, max(1, _cdiv(l, tm_max))), 128)
    while tm > 128 and _tile_footprint_bytes(dp, op, tm) > budget:
        tm -= 128
    if bsz * _cdiv(l, tm) < 2 and tm > 128:
        tm = _round_up(_cdiv(tm, 2), 128)
    lp = _round_up(l, tm)

    # Phases packed as one (GK*Dp, 2) operand [lo | hi], row q = p*Dp + i (lane-broadcast in
    # kernel).  Assumes phase_high > phase_low elementwise (true for the ReLU-KAN construction);
    # required by the single-max basis rewrite.
    lo = jnp.pad(phase_low.astype(jnp.float32), ((0, dp - d), (0, 0)))    # (Dp, GK)
    hi = jnp.pad(phase_high.astype(jnp.float32), ((0, dp - d), (0, 0)))
    ph = jnp.stack([lo.T.reshape(GK * dp), hi.T.reshape(GK * dp)], axis=1)  # (GK*Dp, 2)

    # Weight packing preserves the reference ReLU-KAN "reshape quirk": flat index c of the
    # (D, GK)-ordered basis pairs with flat index c of the (GK, D)-ordered Conv2d weight, so
    # w_conv.reshape(o, d, GK)[o, i, p] multiplies basis(x_i, phase p).  R^2 folded in; bf16
    # (the dot already runs the bf16 MXU pass, so this only halves weight VMEM/DMA).
    wr = w_conv.reshape(o, d, GK).astype(jnp.float32) * (R * R)
    wr = jnp.pad(wr, ((0, op - o), (0, dp - d), (0, 0)))                  # (Op, Dp, GK)
    wk = jnp.transpose(wr, (0, 2, 1)).reshape(op, GK * dp).astype(jnp.bfloat16)
    bk = jnp.pad(b_conv.astype(jnp.float32), (0, op - o)).reshape(op, 1)

    xp = jnp.pad(xu.astype(jnp.float32), ((0, 0), (0, dp - d), (0, lp - l)))

    if _supports_buffered_invariants():
        inv_kwargs = dict(pipeline_mode=pl.Buffered(1))   # single-buffer loop-invariant operands
    else:
        inv_kwargs = {}

    kernel = functools.partial(relukan_kernel, dp=dp)
    out = pl.pallas_call(
        kernel,
        out_shape=jax.ShapeDtypeStruct((bsz, op, lp), jnp.float32),
        grid_spec=pltpu.PrefetchScalarGridSpec(
            num_scalar_prefetch=0,
            grid=(bsz, lp // tm),
            in_specs=[
                pl.BlockSpec((None, dp, tm), lambda b, i: (b, 0, i)),               # X (Dp, TM)
                pl.BlockSpec((GK * dp, 2), lambda b, i: (0, 0), **inv_kwargs),      # phases [lo|hi]
                pl.BlockSpec((op, GK * dp), lambda b, i: (0, 0), **inv_kwargs),     # packed weight
                pl.BlockSpec((op, 1), lambda b, i: (0, 0), **inv_kwargs),           # bias
            ],
            out_specs=pl.BlockSpec((None, op, tm), lambda b, i: (b, 0, i)),
            scratch_shapes=[pltpu.VMEM((GK * dp, tm), jnp.bfloat16)],               # bf16 basis
        ),
        compiler_params=pltpu.CompilerParams(
            dimension_semantics=("parallel", "parallel"),
            vmem_limit_bytes=budget,
        ),
    )(xp, ph, wk, bk)
    return out[:, :o, :l]


# ----------------------------- plain-JAX glue ----------------------------------
def unfold_nchw(x, k, stride, padding):
    """Matches torch.nn.functional.unfold: returns (B, C*k*k, OH*OW) (no big transposes)."""
    b, c, h, w = x.shape
    xp = jnp.pad(x, ((0, 0), (0, 0), (padding, padding), (padding, padding)))
    oh = (h + 2 * padding - k) // stride + 1
    ow = (w + 2 * padding - k) // stride + 1
    cols = [xp[:, :, ki::stride, kj::stride][:, :, :oh, :ow]      # (B, C, OH, OW)
            for ki in range(k) for kj in range(k)]
    cols = jnp.stack(cols, axis=2)                                # (B, C, k*k, OH, OW)
    return cols.reshape(b, c * k * k, oh * ow), oh, ow


@functools.partial(jax.jit, static_argnames=("kernel_size", "stride", "padding", "tm"))
def relukan_conv2d(x, phase_low, phase_high, w_conv, b_conv,
                   kernel_size=3, stride=1, padding=0, tm=1024):
    b, c, h, w = x.shape
    # TODO(synk): fuse the unfold into the kernel to avoid the 9x-expanded im2col HBM round trip.
    unf, oh, ow = unfold_nchw(x, kernel_size, stride, padding)    # (B, C*k*k, L) — kernel layout
    out = relukan_dense_t(unf, phase_low, phase_high, w_conv, b_conv, tm_max=tm)  # (B, O, L)
    o = w_conv.shape[0]
    return out.reshape(b, o, oh, ow)                              # already NCHW-ordered


# ----------------------------- pure-JAX reference -------------------------------
def relukan_conv2d_ref(x, phase_low, phase_high, w_conv, b_conv,
                       kernel_size=3, stride=1, padding=0):
    b, c, h, w = x.shape
    unf, oh, ow = unfold_nchw(x, kernel_size, stride, padding)
    xu = jnp.transpose(unf, (0, 2, 1)).reshape(b * oh * ow, c * kernel_size * kernel_size)
    x1 = jnp.maximum(xu[:, :, None] - phase_low[None], 0.0)
    x2 = jnp.maximum(phase_high[None] - xu[:, :, None], 0.0)
    y = (x1 * x2 * R) ** 2                                        # (N, D, GK)
    yf = y.reshape(y.shape[0], -1)                                # flatten (D, GK)
    wf = w_conv.reshape(w_conv.shape[0], -1)                      # flatten (GK, D)
    out = jnp.dot(yf, wf.T, precision=jax.lax.Precision.HIGHEST) + b_conv[None]
    o = w_conv.shape[0]
    out = out.reshape(b, oh * ow, o)
    return jnp.transpose(out, (0, 2, 1)).reshape(b, o, oh, ow)


# ----------------------------- main ---------------------------------------------
if __name__ == "__main__":
    B, C_in, H, W = 2, 4, 16, 16
    C_out, K, STRIDE, PAD = 8, 3, 1, 1
    D = C_in * K * K

    key = jax.random.PRNGKey(0)
    kx, kw, kb = jax.random.split(key, 3)

    x = jax.random.normal(kx, (B, C_in, H, W), dtype=jnp.float32)

    # Deterministic parameter init (shapes from ReLUKANLayer(D, 5, 3, C_out)):
    base = jnp.arange(-KK, G, dtype=jnp.float32) / G                    # (GK,)
    phase_low = jnp.broadcast_to(base, (D, GK)).astype(jnp.float32)     # (D, GK)
    phase_high = phase_low + (KK + 1) / G                               # (D, GK)
    w_conv = jax.random.normal(kw, (C_out, 1, GK, D), dtype=jnp.float32) / jnp.sqrt(GK * D)
    b_conv = 0.01 * jax.random.normal(kb, (C_out,), dtype=jnp.float32)

    # The single-max basis rewrite requires phase_high > phase_low (true by construction).
    assert bool(jnp.all(phase_high > phase_low)), "ReLU-KAN phases must satisfy high > low"

    out = relukan_conv2d(x, phase_low, phase_high, w_conv, b_conv,
                         kernel_size=K, stride=STRIDE, padding=PAD)
    out = jax.block_until_ready(out)

    ref = relukan_conv2d_ref(x, phase_low, phase_high, w_conv, b_conv,
                             kernel_size=K, stride=STRIDE, padding=PAD)
    assert out.shape == (B, C_out, H, W), out.shape
    # Kernel uses the MXU's default bf16-input / f32-accumulate pass (bf16 basis + weight),
    # the reference uses Precision.HIGHEST; tolerance accounts for that.
    assert jnp.allclose(out, ref, rtol=1e-2, atol=5e-3), float(jnp.max(jnp.abs(out - ref)))

    print("KERNEL_OK")
</pallas_src>

<mosaic_0001>
module attributes {stable_mosaic.version = 11 : i64} {
  func.func @relukan_kernel(%arg0: i32, %arg1: i32, %arg2: memref<1x48x256xf32, #tpu.memory_space<vmem>>, %arg3: memref<384x2xf32, #tpu.memory_space<vmem>>, %arg4: memref<8x384xbf16, #tpu.memory_space<vmem>>, %arg5: memref<8x1xf32, #tpu.memory_space<vmem>>, %arg6: memref<1x8x256xf32, #tpu.memory_space<vmem>>, %arg7: memref<384x256xbf16, #tpu.memory_space<vmem>>) attributes {dimension_semantics = [#tpu.dimension_semantics<parallel>, #tpu.dimension_semantics<parallel>], iteration_bounds = array<i64: 2, 1>, scalar_prefetch = 0 : i64, scratch_operands = 1 : i64, tpu.core_type = #tpu.core_type<tc>, window_params = [{transform_indices = @transform_0, window_bounds = array<i64: 1, 48, 256>}, {pipeline_mode = #tpu.pipeline_mode<synchronous>, transform_indices = @transform_1, window_bounds = array<i64: 384, 2>}, {pipeline_mode = #tpu.pipeline_mode<synchronous>, transform_indices = @transform_2, window_bounds = array<i64: 8, 384>}, {pipeline_mode = #tpu.pipeline_mode<synchronous>, transform_indices = @transform_3, window_bounds = array<i64: 8, 1>}, {transform_indices = @transform_4, window_bounds = array<i64: 1, 8, 256>}]} {
    %c0 = arith.constant 0 : index
    %c0_0 = arith.constant 0 : index
    %c0_1 = arith.constant 0 : index
    %0 = vector.load %arg2[%c0, %c0_0, %c0_1] : memref<1x48x256xf32, #tpu.memory_space<vmem>>, vector<1x48x256xf32>
    %1 = vector.shape_cast %0 : vector<1x48x256xf32> to vector<48x256xf32>
    %c0_2 = arith.constant 0 : index
    %c0_3 = arith.constant 0 : index
    %2 = vector.load %arg3[%c0_2, %c0_3] : memref<384x2xf32, #tpu.memory_space<vmem>>, vector<48x2xf32>
    %3 = vector.extract_strided_slice %2 {offsets = [0, 0], sizes = [48, 1], strides = [1, 1]} : vector<48x2xf32> to vector<48x1xf32>
    %4 = vector.extract_strided_slice %2 {offsets = [0, 1], sizes = [48, 1], strides = [1, 1]} : vector<48x2xf32> to vector<48x1xf32>
    %5 = vector.broadcast %3 : vector<48x1xf32> to vector<48x256xf32>
    %6 = arith.subf %1, %5 : vector<48x256xf32>
    %7 = vector.broadcast %4 : vector<48x1xf32> to vector<48x256xf32>
    %8 = arith.subf %7, %1 : vector<48x256xf32>
    %9 = arith.mulf %6, %8 : vector<48x256xf32>
    %cst = arith.constant 0.000000e+00 : f32
    %10 = vector.broadcast %cst : f32 to vector<48x256xf32>
    %11 = arith.maximumf %9, %10 : vector<48x256xf32>
    %12 = arith.mulf %11, %11 : vector<48x256xf32>
    %13 = arith.truncf %12 : vector<48x256xf32> to vector<48x256xbf16>
    %c0_4 = arith.constant 0 : index
    %c0_5 = arith.constant 0 : index
    %14 = vector.load %arg7[%c0_4, %c0_5] : memref<384x256xbf16, #tpu.memory_space<vmem>>, vector<48x256xbf16>
    tpu.vector_store %arg7[%c0_4, %c0_5], %13 {strides = array<i32>} : memref<384x256xbf16, #tpu.memory_space<vmem>>, vector<48x256xbf16>,
    %c0_6 = arith.constant 0 : index
    %c0_7 = arith.constant 0 : index
    %c0_8 = arith.constant 0 : index
    %15 = vector.load %arg2[%c0_6, %c0_7, %c0_8] : memref<1x48x256xf32, #tpu.memory_space<vmem>>, vector<1x48x256xf32>
    %16 = vector.shape_cast %15 : vector<1x48x256xf32> to vector<48x256xf32>
    %c48 = arith.constant 48 : index
    %c0_9 = arith.constant 0 : index
    %17 = vector.load %arg3[%c48, %c0_9] : memref<384x2xf32, #tpu.memory_space<vmem>>, vector<48x2xf32>
    %18 = vector.extract_strided_slice %17 {offsets = [0, 0], sizes = [48, 1], strides = [1, 1]} : vector<48x2xf32> to vector<48x1xf32>
    %19 = vector.extract_strided_slice %17 {offsets = [0, 1], sizes = [48, 1], strides = [1, 1]} : vector<48x2xf32> to vector<48x1xf32>
    %20 = vector.broadcast %18 : vector<48x1xf32> to vector<48x256xf32>
    %21 = arith.subf %16, %20 : vector<48x256xf32>
    %22 = vector.broadcast %19 : vector<48x1xf32> to vector<48x256xf32>
    %23 = arith.subf %22, %16 : vector<48x256xf32>
    %24 = arith.mulf %21, %23 : vector<48x256xf32>
    %cst_10 = arith.constant 0.000000e+00 : f32
    %25 = vector.broadcast %cst_10 : f32 to vector<48x256xf32>
    %26 = arith.maximumf %24, %25 : vector<48x256xf32>
    %27 = arith.mulf %26, %26 : vector<48x256xf32>
    %28 = arith.truncf %27 : vector<48x256xf32> to vector<48x256xbf16>
    %c48_11 = arith.constant 48 : index
    %c0_12 = arith.constant 0 : index
    %29 = vector.load %arg7[%c48_11, %c0_12] : memref<384x256xbf16, #tpu.memory_space<vmem>>, vector<48x256xbf16>
    tpu.vector_store %arg7[%c48_11, %c0_12], %28 {strides = array<i32>} : memref<384x256xbf16, #tpu.memory_space<vmem>>, vector<48x256xbf16>,
    %c0_13 = arith.constant 0 : index
    %c0_14 = arith.constant 0 : index
    %c0_15 = arith.constant 0 : index
    %30 = vector.load %arg2[%c0_13, %c0_14, %c0_15] : memref<1x48x256xf32, #tpu.memory_space<vmem>>, vector<1x48x256xf32>
    %31 = vector.shape_cast %30 : vector<1x48x256xf32> to vector<48x256xf32>
    %c96 = arith.constant 96 : index
    %c0_16 = arith.constant 0 : index
    %32 = vector.load %arg3[%c96, %c0_16] : memref<384x2xf32, #tpu.memory_space<vmem>>, vector<48x2xf32>
    %33 = vector.extract_strided_slice %32 {offsets = [0, 0], sizes = [48, 1], strides = [1, 1]} : vector<48x2xf32> to vector<48x1xf32>
    %34 = vector.extract_strided_slice %32 {offsets = [0, 1], sizes = [48, 1], strides = [1, 1]} : vector<48x2xf32> to vector<48x1xf32>
    %35 = vector.broadcast %33 : vector<48x1xf32> to vector<48x256xf32>
    %36 = arith.subf %31, %35 : vector<48x256xf32>
    %37 = vector.broadcast %34 : vector<48x1xf32> to vector<48x256xf32>
    %38 = arith.subf %37, %31 : vector<48x256xf32>
    %39 = arith.mulf %36, %38 : vector<48x256xf32>
    %cst_17 = arith.constant 0.000000e+00 : f32
    %40 = vector.broadcast %cst_17 : f32 to vector<48x256xf32>
    %41 = arith.maximumf %39, %40 : vector<48x256xf32>
    %42 = arith.mulf %41, %41 : vector<48x256xf32>
    %43 = arith.truncf %42 : vector<48x256xf32> to vector<48x256xbf16>
    %c96_18 = arith.constant 96 : index
    %c0_19 = arith.constant 0 : index
    %44 = vector.load %arg7[%c96_18, %c0_19] : memref<384x256xbf16, #tpu.memory_space<vmem>>, vector<48x256xbf16>
    tpu.vector_store %arg7[%c96_18, %c0_19], %43 {strides = array<i32>} : memref<384x256xbf16, #tpu.memory_space<vmem>>, vector<48x256xbf16>,
    %c0_20 = arith.constant 0 : index
    %c0_21 = arith.constant 0 : index
    %c0_22 = arith.constant 0 : index
    %45 = vector.load %arg2[%c0_20, %c0_21, %c0_22] : memref<1x48x256xf32, #tpu.memory_space<vmem>>, vector<1x48x256xf32>
    %46 = vector.shape_cast %45 : vector<1x48x256xf32> to vector<48x256xf32>
    %c144 = arith.constant 144 : index
    %c0_23 = arith.constant 0 : index
    %47 = vector.load %arg3[%c144, %c0_23] : memref<384x2xf32, #tpu.memory_space<vmem>>, vector<48x2xf32>
    %48 = vector.extract_strided_slice %47 {offsets = [0, 0], sizes = [48, 1], strides = [1, 1]} : vector<48x2xf32> to vector<48x1xf32>
    %49 = vector.extract_strided_slice %47 {offsets = [0, 1], sizes = [48, 1], strides = [1, 1]} : vector<48x2xf32> to vector<48x1xf32>
    %50 = vector.broadcast %48 : vector<48x1xf32> to vector<48x256xf32>
    %51 = arith.subf %46, %50 : vector<48x256xf32>
    %52 = vector.broadcast %49 : vector<48x1xf32> to vector<48x256xf32>
    %53 = arith.subf %52, %46 : vector<48x256xf32>
    %54 = arith.mulf %51, %53 : vector<48x256xf32>
    %cst_24 = arith.constant 0.000000e+00 : f32
    %55 = vector.broadcast %cst_24 : f32 to vector<48x256xf32>
    %56 = arith.maximumf %54, %55 : vector<48x256xf32>
    %57 = arith.mulf %56, %56 : vector<48x256xf32>
    %58 = arith.truncf %57 : vector<48x256xf32> to vector<48x256xbf16>
    %c144_25 = arith.constant 144 : index
    %c0_26 = arith.constant 0 : index
    %59 = vector.load %arg7[%c144_25, %c0_26] : memref<384x256xbf16, #tpu.memory_space<vmem>>, vector<48x256xbf16>
    tpu.vector_store %arg7[%c144_25, %c0_26], %58 {strides = array<i32>} : memref<384x256xbf16, #tpu.memory_space<vmem>>, vector<48x256xbf16>,
    %c0_27 = arith.constant 0 : index
    %c0_28 = arith.constant 0 : index
    %c0_29 = arith.constant 0 : index
    %60 = vector.load %arg2[%c0_27, %c0_28, %c0_29] : memref<1x48x256xf32, #tpu.memory_space<vmem>>, vector<1x48x256xf32>
    %61 = vector.shape_cast %60 : vector<1x48x256xf32> to vector<48x256xf32>
    %c192 = arith.constant 192 : index
    %c0_30 = arith.constant 0 : index
    %62 = vector.load %arg3[%c192, %c0_30] : memref<384x2xf32, #tpu.memory_space<vmem>>, vector<48x2xf32>
    %63 = vector.extract_strided_slice %62 {offsets = [0, 0], sizes = [48, 1], strides = [1, 1]} : vector<48x2xf32> to vector<48x1xf32>
    %64 = vector.extract_strided_slice %62 {offsets = [0, 1], sizes = [48, 1], strides = [1, 1]} : vector<48x2xf32> to vector<48x1xf32>
    %65 = vector.broadcast %63 : vector<48x1xf32> to vector<48x256xf32>
    %66 = arith.subf %61, %65 : vector<48x256xf32>
    %67 = vector.broadcast %64 : vector<48x1xf32> to vector<48x256xf32>
    %68 = arith.subf %67, %61 : vector<48x256xf32>
    %69 = arith.mulf %66, %68 : vector<48x256xf32>
    %cst_31 = arith.constant 0.000000e+00 : f32
    %70 = vector.broadcast %cst_31 : f32 to vector<48x256xf32>
    %71 = arith.maximumf %69, %70 : vector<48x256xf32>
    %72 = arith.mulf %71, %71 : vector<48x256xf32>
    %73 = arith.truncf %72 : vector<48x256xf32> to vector<48x256xbf16>
    %c192_32 = arith.constant 192 : index
    %c0_33 = arith.constant 0 : index
    %74 = vector.load %arg7[%c192_32, %c0_33] : memref<384x256xbf16, #tpu.memory_space<vmem>>, vector<48x256xbf16>
    tpu.vector_store %arg7[%c192_32, %c0_33], %73 {strides = array<i32>} : memref<384x256xbf16, #tpu.memory_space<vmem>>, vector<48x256xbf16>,
    %c0_34 = arith.constant 0 : index
    %c0_35 = arith.constant 0 : index
    %c0_36 = arith.constant 0 : index
    %75 = vector.load %arg2[%c0_34, %c0_35, %c0_36] : memref<1x48x256xf32, #tpu.memory_space<vmem>>, vector<1x48x256xf32>
    %76 = vector.shape_cast %75 : vector<1x48x256xf32> to vector<48x256xf32>
    %c240 = arith.constant 240 : index
    %c0_37 = arith.constant 0 : index
    %77 = vector.load %arg3[%c240, %c0_37] : memref<384x2xf32, #tpu.memory_space<vmem>>, vector<48x2xf32>
    %78 = vector.extract_strided_slice %77 {offsets = [0, 0], sizes = [48, 1], strides = [1, 1]} : vector<48x2xf32> to vector<48x1xf32>
    %79 = vector.extract_strided_slice %77 {offsets = [0, 1], sizes = [48, 1], strides = [1, 1]} : vector<48x2xf32> to vector<48x1xf32>
    %80 = vector.broadcast %78 : vector<48x1xf32> to vector<48x256xf32>
    %81 = arith.subf %76, %80 : vector<48x256xf32>
    %82 = vector.broadcast %79 : vector<48x1xf32> to vector<48x256xf32>
    %83 = arith.subf %82, %76 : vector<48x256xf32>
    %84 = arith.mulf %81, %83 : vector<48x256xf32>
    %cst_38 = arith.constant 0.000000e+00 : f32
    %85 = vector.broadcast %cst_38 : f32 to vector<48x256xf32>
    %86 = arith.maximumf %84, %85 : vector<48x256xf32>
    %87 = arith.mulf %86, %86 : vector<48x256xf32>
    %88 = arith.truncf %87 : vector<48x256xf32> to vector<48x256xbf16>
    %c240_39 = arith.constant 240 : index
    %c0_40 = arith.constant 0 : index
    %89 = vector.load %arg7[%c240_39, %c0_40] : memref<384x256xbf16, #tpu.memory_space<vmem>>, vector<48x256xbf16>
    tpu.vector_store %arg7[%c240_39, %c0_40], %88 {strides = array<i32>} : memref<384x256xbf16, #tpu.memory_space<vmem>>, vector<48x256xbf16>,
    %c0_41 = arith.constant 0 : index
    %c0_42 = arith.constant 0 : index
    %c0_43 = arith.constant 0 : index
    %90 = vector.load %arg2[%c0_41, %c0_42, %c0_43] : memref<1x48x256xf32, #tpu.memory_space<vmem>>, vector<1x48x256xf32>
    %91 = vector.shape_cast %90 : vector<1x48x256xf32> to vector<48x256xf32>
    %c288 = arith.constant 288 : index
    %c0_44 = arith.constant 0 : index
    %92 = vector.load %arg3[%c288, %c0_44] : memref<384x2xf32, #tpu.memory_space<vmem>>, vector<48x2xf32>
    %93 = vector.extract_strided_slice %92 {offsets = [0, 0], sizes = [48, 1], strides = [1, 1]} : vector<48x2xf32> to vector<48x1xf32>
    %94 = vector.extract_strided_slice %92 {offsets = [0, 1], sizes = [48, 1], strides = [1, 1]} : vector<48x2xf32> to vector<48x1xf32>
    %95 = vector.broadcast %93 : vector<48x1xf32> to vector<48x256xf32>
    %96 = arith.subf %91, %95 : vector<48x256xf32>
    %97 = vector.broadcast %94 : vector<48x1xf32> to vector<48x256xf32>
    %98 = arith.subf %97, %91 : vector<48x256xf32>
    %99 = arith.mulf %96, %98 : vector<48x256xf32>
    %cst_45 = arith.constant 0.000000e+00 : f32
    %100 = vector.broadcast %cst_45 : f32 to vector<48x256xf32>
    %101 = arith.maximumf %99, %100 : vector<48x256xf32>
    %102 = arith.mulf %101, %101 : vector<48x256xf32>
    %103 = arith.truncf %102 : vector<48x256xf32> to vector<48x256xbf16>
    %c288_46 = arith.constant 288 : index
    %c0_47 = arith.constant 0 : index
    %104 = vector.load %arg7[%c288_46, %c0_47] : memref<384x256xbf16, #tpu.memory_space<vmem>>, vector<48x256xbf16>
    tpu.vector_store %arg7[%c288_46, %c0_47], %103 {strides = array<i32>} : memref<384x256xbf16, #tpu.memory_space<vmem>>, vector<48x256xbf16>,
    %c0_48 = arith.constant 0 : index
    %c0_49 = arith.constant 0 : index
    %c0_50 = arith.constant 0 : index
    %105 = vector.load %arg2[%c0_48, %c0_49, %c0_50] : memref<1x48x256xf32, #tpu.memory_space<vmem>>, vector<1x48x256xf32>
    %106 = vector.shape_cast %105 : vector<1x48x256xf32> to vector<48x256xf32>
    %c336 = arith.constant 336 : index
    %c0_51 = arith.constant 0 : index
    %107 = vector.load %arg3[%c336, %c0_51] : memref<384x2xf32, #tpu.memory_space<vmem>>, vector<48x2xf32>
    %108 = vector.extract_strided_slice %107 {offsets = [0, 0], sizes = [48, 1], strides = [1, 1]} : vector<48x2xf32> to vector<48x1xf32>
    %109 = vector.extract_strided_slice %107 {offsets = [0, 1], sizes = [48, 1], strides = [1, 1]} : vector<48x2xf32> to vector<48x1xf32>
    %110 = vector.broadcast %108 : vector<48x1xf32> to vector<48x256xf32>
    %111 = arith.subf %106, %110 : vector<48x256xf32>
    %112 = vector.broadcast %109 : vector<48x1xf32> to vector<48x256xf32>
    %113 = arith.subf %112, %106 : vector<48x256xf32>
    %114 = arith.mulf %111, %113 : vector<48x256xf32>
    %cst_52 = arith.constant 0.000000e+00 : f32
    %115 = vector.broadcast %cst_52 : f32 to vector<48x256xf32>
    %116 = arith.maximumf %114, %115 : vector<48x256xf32>
    %117 = arith.mulf %116, %116 : vector<48x256xf32>
    %118 = arith.truncf %117 : vector<48x256xf32> to vector<48x256xbf16>
    %c336_53 = arith.constant 336 : index
    %c0_54 = arith.constant 0 : index
    %119 = vector.load %arg7[%c336_53, %c0_54] : memref<384x256xbf16, #tpu.memory_space<vmem>>, vector<48x256xbf16>
    tpu.vector_store %arg7[%c336_53, %c0_54], %118 {strides = array<i32>} : memref<384x256xbf16, #tpu.memory_space<vmem>>, vector<48x256xbf16>,
    %c0_55 = arith.constant 0 : index
    %c0_56 = arith.constant 0 : index
    %120 = vector.load %arg4[%c0_55, %c0_56] : memref<8x384xbf16, #tpu.memory_space<vmem>>, vector<8x384xbf16>
    %c0_57 = arith.constant 0 : index
    %c0_58 = arith.constant 0 : index
    %121 = vector.load %arg7[%c0_57, %c0_58] : memref<384x256xbf16, #tpu.memory_space<vmem>>, vector<384x256xbf16>
    %cst_59 = arith.constant dense<0.000000e+00> : vector<8x256xf32>
    %122 = tpu.matmul %120, %121, %cst_59 {dimension_numbers = #tpu.dot_dimension_numbers<[1], [0], [0], [1], [0, 0, 1, 1], [], []>} : vector<8x384xbf16>, vector<384x256xbf16>, vector<8x256xf32> -> vector<8x256xf32>
    %c0_60 = arith.constant 0 : index
    %c0_61 = arith.constant 0 : index
    %123 = vector.load %arg5[%c0_60, %c0_61] : memref<8x1xf32, #tpu.memory_space<vmem>>, vector<8x1xf32>
    %124 = vector.broadcast %123 : vector<8x1xf32> to vector<8x256xf32>
    %125 = arith.addf %122, %124 : vector<8x256xf32>
    %c0_62 = arith.constant 0 : index
    %c0_63 = arith.constant 0 : index
    %c0_64 = arith.constant 0 : index
    %126 = vector.load %arg6[%c0_62, %c0_63, %c0_64] : memref<1x8x256xf32, #tpu.memory_space<vmem>>, vector<1x8x256xf32>
    %127 = vector.shape_cast %126 : vector<1x8x256xf32> to vector<8x256xf32>
    %128 = vector.shape_cast %125 : vector<8x256xf32> to vector<1x8x256xf32>
    tpu.vector_store %arg6[%c0_62, %c0_63, %c0_64], %128 {strides = array<i32>} : memref<1x8x256xf32, #tpu.memory_space<vmem>>, vector<1x8x256xf32>,
    return
  }
  func.func @transform_0(%arg0: i32, %arg1: i32) -> (i32, i32, i32) {
    %c0_i32 = arith.constant 0 : i32
    %c0_i32_0 = arith.constant 0 : i32
    return %arg0, %c0_i32, %arg1 : i32, i32, i32
  }
  func.func @transform_1(%arg0: i32, %arg1: i32) -> (i32, i32) {
    %c0_i32 = arith.constant 0 : i32
    %c0_i32_0 = arith.constant 0 : i32
    %c0_i32_1 = arith.constant 0 : i32
    return %c0_i32, %c0_i32_0 : i32, i32
  }
  func.func @transform_2(%arg0: i32, %arg1: i32) -> (i32, i32) {
    %c0_i32 = arith.constant 0 : i32
    %c0_i32_0 = arith.constant 0 : i32
    %c0_i32_1 = arith.constant 0 : i32
    return %c0_i32, %c0_i32_0 : i32, i32
  }
  func.func @transform_3(%arg0: i32, %arg1: i32) -> (i32, i32) {
    %c0_i32 = arith.constant 0 : i32
    %c0_i32_0 = arith.constant 0 : i32
    %c0_i32_1 = arith.constant 0 : i32
    return %c0_i32, %c0_i32_0 : i32, i32
  }
  func.func @transform_4(%arg0: i32, %arg1: i32) -> (i32, i32, i32) {
    %c0_i32 = arith.constant 0 : i32
    %c0_i32_0 = arith.constant 0 : i32
    return %arg0, %c0_i32, %arg1 : i32, i32, i32
  }
}

</mosaic_0001>

<bundles_post_ra>
// kernel: relukan_conv2d.1
= control target key start
LH: loop header
LB: loop body
LE: loop exit
PB: predicated region body
PF: predicated region fallthrough
CT: control target
= control target key end

     0   :  { %s1783_s15 = smov 0   ;;  %s1785_s16 = smov 0   ;;  %s2473_s0 = inlined_call_operand.vmem [shape: f32[2,48,256], index: 0, kind: input, shape index: {}]   ;;  %s2474_s1 = inlined_call_operand.vmem [shape: f32[384,2], index: 1, kind: input, shape index: {}]   ;;  %s2475_s2 = inlined_call_operand.vmem [shape: bf16[8,384], index: 2, kind: input, shape index: {}]   ;;  %s2476_s3 = inlined_call_operand.vmem [shape: f32[8,1], index: 3, kind: input, shape index: {}]   ;;  %s2477_s4 = inlined_call_operand.vmem [shape: f32[2,8,256], index: 4, kind: output, shape index: {}]  }
   0x1   :  { %s1787_s17 = smov 0  }
   0x2 LB: > { %s26_s18 = sadd.s32 1, %s1750_s16  ;;  %p1632_p0 = scmp.ge.s32.totalorder %s1754_s17, 1  ;;  %s1754_s17 = sphi %s1787_s17, %s14_s17   ;;  %s1750_s16 = sphi %s1785_s16, %s2499_s16   ;;  %s1746_s15 = sphi %s1783_s15, %s2498_s15  }
   0x3   : > { %p28_p1 = scmp.ge.s32.totalorder %s26_s18, 2  ;;  %p183_p2 = scmp.lt.s32.totalorder %s1754_s17, 3 }
   0x5   : > { %s2501_s18 = smov (%p28_p1, %s26_s18), 0  ;;  %p184_p3 = pnand %p1632_p0, %p183_p2 }
   0x7   : > { %187 = sbr.rel (%p184_p3) target bundleno = 649 (0x289), region = 36 }
   0xe   : > { %v252_v0 = vld [vmem:[%s2474_s1 + $0x10] sm:$0xff]  ;;  %v250_v1 = vld [vmem:[%s2474_s1] sm:$0xff]  ;;  %v2478_v2 = vmov 1   ;;  %v2480_v3 = vmov 0   ;;  %v253_v4 = vld [vmem:[%s2474_s1 + $0x18] sm:$0xff]  ;;  %p218_p4 = scmp.lt.s32.totalorder %s1746_s15, 1 }
   0xf   : > { %1674 = vset.pattern.permute.xlu0 %v2478_v2  ;;  %1673 = vset.pattern.permute.xlu1 %v2480_v3  ;;  %v255_v5 = vld [vmem:[%s2474_s1 + $0x28] sm:$0xff]  ;;  %v396_v6 = vld [vmem:[%s2474_s1 + $0x40] sm:$0xff]  ;;  %v682_v11 = vld [vmem:[%s2474_s1 + $0x90] sm:$0xff] }
  0x10   : > { %268 = vperm.xlu1 %1673, %v252_v0   ;;  %299 = vperm.xlu0 %1674, %v250_v1   ;;  %v251_v7 = vld [vmem:[%s2474_s1 + $0x8] sm:$0xff]  ;;  %v538_v8 = vld [vmem:[%s2474_s1 + $0x60] sm:$0xff]  ;;  %v394_v12 = vld [vmem:[%s2474_s1 + $0x30] sm:$0xff]  ;;  %s2503_s15 = smov (!%p218_p4, %s1746_s15), 1 }
  0x11   : > { %1530 = vmatprep.mubr.bf16.mxu0 %v2480_v3  ;;  %v542_v9 = vld [vmem:[%s2474_s1 + $0x80] sm:$0xff]  ;;  %v1850_v14 = vld [vmem:[%s2474_s1 + $0xb0] sm:$0xff]  ;;  %v395_v15 = vld [vmem:[%s2474_s1 + $0x38] sm:$0xff]  ;;  %s1646_s7 = smul.u32 96, %s2503_s15  ;;  %s1641_s11 = sshll.u32 %s2503_s15, 4 }
  0x12   : > { %v254_v10 = vld [vmem:[%s2474_s1 + $0x20] sm:$0xff]  ;;  %v397_v17 = vld [vmem:[%s2474_s1 + $0x48] sm:$0xff]  ;;  %v1869_v18 = vld [vmem:[%s2474_s1 + $0xd0] sm:$0xff]  ;;  %s235_s14 = scalar_lea.vmem %s2477_s4, %s1641_s11 }
  0x13   : > { %v1844_v13 = vld [vmem:[%s2474_s1 + $0xa0] sm:$0xff]  ;;  %v1883_v20 = vld [vmem:[%s2474_s1 + $0xf0] sm:$0xff]  ;;  %v399_v22 = vld [vmem:[%s2474_s1 + $0x58] sm:$0xff]  ;;  %s2028_s10 = scalar_lea.vmem %s2473_s0, %s1646_s7 }
  0x14   : > { %273 = vperm.xlu1 %1673, %v253_v4   ;;  %311 = vperm.xlu0 %1674, %v253_v4   ;;  %v1860_v16 = vld [vmem:[%s2474_s1 + $0xc0] sm:$0xff]  ;;  %v398_v21 = vld [vmem:[%s2474_s1 + $0x50] sm:$0xff]  ;;  %v539_v23 = vld [vmem:[%s2474_s1 + $0x68] sm:$0xff] }
  0x15   : > { %v1876_v19 = vld [vmem:[%s2474_s1 + $0xe0] sm:$0xff]  ;;  %v540_v24 = vld [vmem:[%s2474_s1 + $0x70] sm:$0xff]  ;;  %v541_v25 = vld [vmem:[%s2474_s1 + $0x78] sm:$0xff] }
  0x16   : > { %v543_v26 = vld [vmem:[%s2474_s1 + $0x88] sm:$0xff]  ;;  %v975_v28 = vld [vmem:[%s2474_s1 + $0x118] sm:$0xff]  ;;  %v972_v29 = vld [vmem:[%s2474_s1 + $0x100] sm:$0xff] }
  0x17   : > { %v973_v27 = vld [vmem:[%s2474_s1 + $0x108] sm:$0xff]  ;;  %v683_v31 = vld [vmem:[%s2474_s1 + $0x98] sm:$0xff]  ;;  %v974_v34 = vld [vmem:[%s2474_s1 + $0x110] sm:$0xff] }
  0x18   : > { %283 = vperm.xlu1 %1673, %v255_v5   ;;  %319 = vperm.xlu0 %1674, %v255_v5   ;;  %v1115_v30 = vld [vmem:[%s2474_s1 + $0x128] sm:$0xff]  ;;  %v1935_v32 = vld [vmem:[%s2474_s1 + $0x138] sm:$0xff]  ;;  %v1114_v48 = vld [vmem:[%s2474_s1 + $0x120] sm:$0xff] }
  0x19   : > { %v1944_v33 = vld [vmem:[%s2474_s1 + $0x148] sm:$0xff]  ;;  %v1956_v35 = vld [vmem:[%s2474_s1 + $0x158] sm:$0xff]  ;;  %v1440_v50 = vld [vmem:[%s2476_s3] sm:$0xff] }
  0x1a   : > { %v685_v40 = vld [vmem:[%s2474_s1 + $0xa8] sm:$0xff]  ;;  %v1987_v46 = vld [vmem:[%s2474_s1 + $0x178] sm:$0xff]  ;;  %v2033_v60 = vld [vmem:[%s2028_s10 + $0x30] sm:$0xff] }
  0x1b   : > { %v1972_v41 = vld [vmem:[%s2474_s1 + $0x168] sm:$0xff]  ;;  %v687_v56 = vld [vmem:[%s2474_s1 + $0xb8] sm:$0xff]  ;;  %v2042_v63 = vld [vmem:[%s2028_s10 + $0x50] sm:$0xff] }
  0x1c   : > { %1675 = vset.pattern.permute.xlu1 %v2478_v2  ;;  %451 = vperm.xlu0 %1674, %v396_v6   ;;  %v2036_v61 = vld [vmem:[%s2028_s10 + $0x38] sm:$0xff] }
  0x1d   : > { %303 = vperm.xlu1 %1675, %v251_v7  }
  0x20   : > { %587 = vperm.xlu0 %1674, %v538_v8  }
  0x21   : > { %307 = vperm.xlu1 %1675, %v252_v0  }
  0x24   : > { %603 = vperm.xlu0 %1674, %v542_v9  }
  0x25   : > { %315 = vperm.xlu1 %1675, %v254_v10  }
  0x28   : > { %731 = vperm.xlu0 %1674, %v682_v11  }
  0x29   : > { %1676 = vset.pattern.permute.xlu1 %v2480_v3 }
  0x2a   : > { %402 = vperm.xlu1 %1676, %v394_v12  }
  0x2c   : > { %739 = vperm.xlu0 %1674, %v1844_v13  }
  0x2e   : > { %1677 = vset.pattern.permute.xlu1 %v2478_v2 }
  0x2f   : > { %443 = vperm.xlu1 %1677, %v394_v12  }
  0x30   : > { %747 = vperm.xlu0 %1674, %v1850_v14  }
  0x33   : > { %447 = vperm.xlu1 %1677, %v395_v15  }
  0x34   : > { %875 = vperm.xlu0 %1674, %v1860_v16  }
  0x37   : > { %1678 = vset.pattern.permute.xlu1 %v2480_v3 }
  0x38   : > { %417 = vperm.xlu1 %1678, %v397_v17   ;;  %883 = vperm.xlu0 %1674, %v1869_v18  }
  0x3c   : > { %1679 = vset.pattern.permute.xlu1 %v2478_v2  ;;  %891 = vperm.xlu0 %1674, %v1876_v19  }
  0x3d   : > { %455 = vperm.xlu1 %1679, %v397_v17  }
  0x40   : > { %1019 = vperm.xlu0 %1674, %v1883_v20  }
  0x41   : > { %1680 = vset.pattern.permute.xlu1 %v2480_v3 }
  0x42   : > { %422 = vperm.xlu1 %1680, %v398_v21  }
  0x44   : > { %1715 = vset.pattern.permute.xlu0 %v2480_v3 }
  0x45   : > { %258 = vperm.xlu0 %1715, %v250_v1  }
  0x46   : > { %1681 = vset.pattern.permute.xlu1 %v2478_v2 }
  0x47   : > { %459 = vperm.xlu1 %1681, %v398_v21   ;;  %v2075_v21 = vld [vmem:[%s2028_s10 + $0x20] sm:$0xff] }
  0x49   : > { %263 = vperm.xlu0 %1715, %v251_v7  }
  0x4b   : > { %463 = vperm.xlu1 %1681, %v399_v22  }
  0x4d   : > { %278 = vperm.xlu0 %1715, %v254_v10  }
  0x4f   : > { %1682 = vset.pattern.permute.xlu1 %v2480_v3 }
  0x50   : > { %551 = vperm.xlu1 %1682, %v539_v23  }
  0x51   : > { %407 = vperm.xlu0 %1715, %v395_v15  }
  0x54   : > { %1683 = vset.pattern.permute.xlu1 %v2478_v2 }
  0x55   : > { %591 = vperm.xlu1 %1683, %v539_v23   ;;  %412 = vperm.xlu0 %1715, %v396_v6   ;;  %v2051_v6 = vld [vmem:[%s2028_s10 + $0x58] sm:$0xff] }
  0x59   : > { %1684 = vset.pattern.permute.xlu1 %v2480_v3  ;;  %427 = vperm.xlu0 %1715, %v399_v22  }
  0x5a   : > { %556 = vperm.xlu1 %1684, %v540_v24  }
  0x5d   : > { %546 = vperm.xlu0 %1715, %v538_v8  }
  0x5e   : > { %1685 = vset.pattern.permute.xlu1 %v2478_v2 }
  0x5f   : > { %595 = vperm.xlu1 %1685, %v540_v24  }
  0x61   : > { %561 = vperm.xlu0 %1715, %v541_v25  }
  0x63   : > { %599 = vperm.xlu1 %1685, %v541_v25  }
  0x65   : > { %566 = vperm.xlu0 %1715, %v542_v9   ;;  %v1116_v9 = vld [vmem:[%s2474_s1 + $0x130] sm:$0xff] }
  0x67   : > { %1686 = vset.pattern.permute.xlu1 %v2480_v3 }
  0x68   : > { %571 = vperm.xlu1 %1686, %v543_v26  }
  0x69   : > { %993 = vperm.xlu0 %1715, %v973_v27  }
  0x6c   : > { %1687 = vset.pattern.permute.xlu1 %v2478_v2 }
  0x6d   : > { %607 = vperm.xlu1 %1687, %v543_v26   ;;  %690 = vperm.xlu0 %1715, %v682_v11  }
  0x71   : > { %1688 = vset.pattern.permute.xlu1 %v2480_v3  ;;  %1003 = vperm.xlu0 %1715, %v975_v28  }
  0x72   : > { %988 = vperm.xlu1 %1688, %v972_v29  }
  0x75   : > { %700 = vperm.xlu0 %1715, %v1844_v13  }
  0x76   : > { %1689 = vset.pattern.permute.xlu1 %v2478_v2 }
  0x77   : > { %1027 = vperm.xlu1 %1689, %v972_v29  }
  0x79   : > { %1127 = vperm.xlu0 %1715, %v1115_v30  }
  0x7b   : > { %1031 = vperm.xlu1 %1689, %v973_v27  }
  0x7d   : > { %710 = vperm.xlu0 %1715, %v1850_v14  }
  0x7f   : > { %1690 = vset.pattern.permute.xlu1 %v2480_v3 }
  0x80   : > { %695 = vperm.xlu1 %1690, %v683_v31  }
  0x81   : > { %1137 = vperm.xlu0 %1715, %v1935_v32  }
  0x84   : > { %1691 = vset.pattern.permute.xlu1 %v2478_v2 }
  0x85   : > { %735 = vperm.xlu1 %1691, %v683_v31   ;;  %834 = vperm.xlu0 %1715, %v1860_v16   ;;  %v2092_v31 = vld [vmem:[%s2028_s10 + $0x8] sm:$0xff] }
  0x89   : > { %1692 = vset.pattern.permute.xlu1 %v2480_v3  ;;  %1147 = vperm.xlu0 %1715, %v1944_v33  }
  0x8a   : > { %998 = vperm.xlu1 %1692, %v974_v34  }
  0x8d   : > { %844 = vperm.xlu0 %1715, %v1869_v18  }
  0x8e   : > { %1693 = vset.pattern.permute.xlu1 %v2478_v2 }
  0x8f   : > { %v1958_v36 = vpop.permute.xlu1 %268  ;;  %1035 = vperm.xlu1 %1693, %v974_v34   ;;  %v1960_v37 = vpop.permute.xlu0 %299 }
  0x91   : > { %1271 = vperm.xlu0 %1715, %v1956_v35  }
  0x93   : > { %v1963_v38 = vpop.permute.xlu1 %273  ;;  %1039 = vperm.xlu1 %1693, %v975_v28   ;;  %v312_v39 = vpop.permute.xlu0 %311  ;;  %v2087_v28 = vld [vmem:[%s2028_s10] sm:$0xff] }
  0x94   : > { %v292_v0 = vsub.f32 %v2033_v60, %v1963_v38  ;;  %v293_v1 = vsub.f32 %v2036_v61, %v1963_v38  ;;  %v328_v4 = vsub.f32 %v312_v39, %v2033_v60  ;;  %v329_v5 = vsub.f32 %v312_v39, %v2036_v61 }
  0x95   : > { %854 = vperm.xlu0 %1715, %v1876_v19   ;;  %v2072_v19 = vld [vmem:[%s2028_s10 + $0x28] sm:$0xff]  ;;  %v322_v34 = vsub.f32 %v1960_v37, %v2087_v28 }
  0x96   : > { %v340_v14 = vmul.f32 %v328_v4, %v292_v0  ;;  %v341_v15 = vmul.f32 %v329_v5, %v293_v1  ;;  %v291_v27 = vsub.f32 %v2072_v19, %v1958_v36 }
  0x97   : > { %v1974_v42 = vpop.permute.xlu1 %283  ;;  %1694 = vset.pattern.permute.xlu1 %v2480_v3  ;;  %v320_v43 = vpop.permute.xlu0 %319 }
  0x98   : > { %705 = vperm.xlu1 %1694, %v685_v40   ;;  %v296_v10 = vsub.f32 %v2042_v63, %v1974_v42  ;;  %v332_v11 = vsub.f32 %v320_v43, %v2042_v63  ;;  %v297_v12 = vsub.f32 %v2051_v6, %v1974_v42  ;;  %v333_v13 = vsub.f32 %v320_v43, %v2051_v6  ;;  %v2102_v42 = vld [vmem:[%s2028_s10 + $0x18] sm:$0xff] }
  0x99   : > { %1281 = vperm.xlu0 %1715, %v1972_v41   ;;  %v352_v22 = vmax.f32 %v340_v14, 0.0  ;;  %v353_v23 = vmax.f32 %v341_v15, 0.0  ;;  %v323_v43 = vsub.f32 %v1960_v37, %v2092_v31 }
  0x9a   : > { %v344_v17 = vmul.f32 %v332_v11, %v296_v10 }
  0x9b   : > { %v1978_v44 = vpop.permute.xlu0 %451 }
  0x9c   : > { %1695 = vset.pattern.permute.xlu1 %v2478_v2  ;;  %v1981_v45 = vpop.permute.xlu1 %303  ;;  %v356_v29 = vmax.f32 %v344_v17, 0.0 }
  0x9d   : > { %743 = vperm.xlu1 %1695, %v685_v40   ;;  %978 = vperm.xlu0 %1715, %v1883_v20   ;;  %v345_v20 = vmul.f32 %v333_v13, %v297_v12  ;;  %v2099_v40 = vld [vmem:[%s2028_s10 + $0x10] sm:$0xff]  ;;  %v325_v10 = vsub.f32 %v1981_v45, %v2102_v42  ;;  %v2128_v12 = vld [vmem:[%s2028_s10 + $0x40] sm:$0xff] }
  0x9e   : > { %v2117_v4 = vmul.f32 %v356_v29, %v356_v29 }
  0x9f   : > { %v1989_v47 = vpop.permute.xlu0 %587  ;;  %v357_v38 = vmax.f32 %v345_v20, 0.0  ;;  %v2142_v20 = vld [vmem:[%s2028_s10 + $0x48] sm:$0xff] }
  0xa0   : > { %v1994_v49 = vpop.permute.xlu1 %307 }
  0xa1   : > { %1696 = vset.pattern.permute.xlu1 %v2480_v3  ;;  %1291 = vperm.xlu0 %1715, %v1987_v46   ;;  %v327_v24 = vsub.f32 %v1994_v49, %v2072_v19  ;;  %v326_v25 = vsub.f32 %v1994_v49, %v2075_v21  ;;  %v2108_v49 = vmul.f32 %v353_v23, %v353_v23 }
  0xa2   : > { %1122 = vperm.xlu1 %1696, %v1114_v48   ;;  %v2125_v11 = vmul.f32 %v357_v38, %v357_v38 }
  0xa3   : > { %v2001_v51 = vpop.permute.xlu0 %603 }
  0xa4   : > { %v2003_v52 = vpop.permute.xlu1 %315 }
  0xa5   : > { %1443 = vperm.xlu0 %1715, %v1440_v50  }
  0xa6   : > { %1697 = vset.pattern.permute.xlu1 %v2478_v2 }
  0xa7   : > { %1163 = vperm.xlu1 %1697, %v1114_v48   ;;  %v2007_v53 = vpop.permute.xlu0 %731  ;;  %v2106_v48 = vmul.f32 %v352_v22, %v352_v22 }
  0xa9   : > { %v2009_v54 = vpop.permute.xlu1 %402 }
  0xaa   : > { %v430_v13 = vsub.f32 %v2087_v28, %v2009_v54  ;;  %v431_v22 = vsub.f32 %v2092_v31, %v2009_v54  ;;  %v330_v54 = vsub.f32 %v2003_v52, %v2128_v12 }
  0xab   : > { %1167 = vperm.xlu1 %1697, %v1115_v30   ;;  %v2014_v55 = vpop.permute.xlu0 %739  ;;  %v290_v30 = vsub.f32 %v2075_v21, %v1958_v36  ;;  %v339_v36 = vmul.f32 %v327_v24, %v291_v27 }
  0xad   : > { %v338_v0 = vmul.f32 %v326_v25, %v290_v30  ;;  %v351_v15 = vmax.f32 %v339_v36, 0.0 }
  0xae   : > { %v2020_v57 = vpop.permute.xlu1 %443 }
  0xaf   : > { %1698 = vset.pattern.permute.xlu1 %v2480_v3  ;;  %v2023_v58 = vpop.permute.xlu0 %747  ;;  %v466_v1 = vsub.f32 %v2020_v57, %v2087_v28  ;;  %v467_v37 = vsub.f32 %v2020_v57, %v2092_v31  ;;  %v827_v57 = vld [vmem:[%s2474_s1 + $0xc8] sm:$0xff]  ;;  %v350_v24 = vmax.f32 %v338_v0, 0.0 }
  0xb0   : > { %715 = vperm.xlu1 %1698, %v687_v56  }
  0xb1   : > { %v2146_v25 = vmul.f32 %v466_v1, %v430_v13  ;;  %v2151_v38 = vmul.f32 %v467_v37, %v431_v22  ;;  %v331_v1 = vsub.f32 %v2003_v52, %v2142_v20  ;;  %v363_v22 = vmul.f32 %v351_v15, %v351_v15 }
  0xb2   : > { %v2030_v59 = vpop.permute.xlu1 %447  ;;  %v2170_v17 = vmul.f32 %v350_v24, %v350_v24 }
  0xb3   : > { %v2038_v62 = vpop.permute.xlu0 %875  ;;  %v490_v30 = vmax.f32 %v2146_v25, 0.0  ;;  %v468_v50 = vsub.f32 %v2030_v59, %v2099_v40 }
  0xb4   : > { %1699 = vset.pattern.permute.xlu1 %v2478_v2 }
  0xb5   : > { %751 = vperm.xlu1 %1699, %v687_v56  }
  0xb7   : > { %v2053_v7 = vpop.permute.xlu1 %417  ;;  %v2055_v8 = vpop.permute.xlu0 %883 }
  0xb8   : > { %2485 = vst [vmem:[#allocation3_spill] sm:$0xff] %v2055_v8  ;;  %v436_v37 = vsub.f32 %v2033_v60, %v2053_v7 }
  0xb9   : > { %1700 = vset.pattern.permute.xlu1 %v2480_v3 }
  0xba   : > { %1132 = vperm.xlu1 %1700, %v1116_v9  }
  0xbb   : > { %v2067_v16 = vpop.permute.xlu0 %891 }
  0xbc   : > { %2486 = vst [vmem:[#allocation4_spill] sm:$0xff] %v2067_v16  ;;  %v2069_v18 = vpop.permute.xlu1 %455 }
  0xbd   : > { %v472_v36 = vsub.f32 %v2069_v18, %v2033_v60  ;;  %v473_v0 = vsub.f32 %v2069_v18, %v2036_v61  ;;  %v437_v18 = vsub.f32 %v2036_v61, %v2053_v7 }
  0xbe   : > { %1701 = vset.pattern.permute.xlu1 %v2478_v2 }
  0xbf   : > { %1171 = vperm.xlu1 %1701, %v1116_v9   ;;  %v2082_v26 = vpop.permute.xlu0 %1019  ;;  %v324_v9 = vsub.f32 %v1981_v45, %v2099_v40  ;;  %v484_v56 = vmul.f32 %v472_v36, %v436_v37 }
  0xc0   : > { %2487 = vst [vmem:[#allocation5_spill] sm:$0xff] %v2082_v26 }
  0xc1   : > { %v2096_v39 = vpop.permute.xlu1 %422 }
  0xc3   : > { %1175 = vperm.xlu1 %1701, %v1935_v32  }
  0xc4   : > { %v259_v5 = vpop.permute.xlu0 %258 }
  0xc5   : > { %v286_v32 = vsub.f32 %v2087_v28, %v259_v5  ;;  %v287_v14 = vsub.f32 %v2092_v31, %v259_v5 }
  0xc6   : > { %v460_v23 = vpop.permute.xlu1 %459 }
  0xc7   : > { %v334_v27 = vmul.f32 %v322_v34, %v286_v32  ;;  %1702 = vset.pattern.permute.xlu1 %v2480_v3  ;;  %v335_v29 = vmul.f32 %v323_v43, %v287_v14  ;;  %v474_v15 = vsub.f32 %v460_v23, %v2128_v12  ;;  %v475_v36 = vsub.f32 %v460_v23, %v2142_v20 }
  0xc8   : > { %839 = vperm.xlu1 %1702, %v827_v57   ;;  %v264_v5 = vpop.permute.xlu0 %263  ;;  %v439_v23 = vsub.f32 %v2142_v20, %v2096_v39 }
  0xc9   : > { %v288_v34 = vsub.f32 %v2099_v40, %v264_v5  ;;  %v289_v43 = vsub.f32 %v2102_v42, %v264_v5  ;;  %v347_v32 = vmax.f32 %v335_v29, 0.0  ;;  %v346_v14 = vmax.f32 %v334_v27, 0.0 }
  0xca   : > { %v2165_v13 = vpop.permute.xlu1 %463  ;;  %v491_v5 = vmax.f32 %v2151_v38, 0.0  ;;  %v485_v27 = vmul.f32 %v473_v0, %v437_v18  ;;  %v1118_v0 = vld [vmem:[%s2474_s1 + $0x140] sm:$0xff] }
  0xcb   : > { %v336_v45 = vmul.f32 %v324_v9, %v288_v34  ;;  %v337_v29 = vmul.f32 %v325_v10, %v289_v43  ;;  %v359_v24 = vmul.f32 %v347_v32, %v347_v32  ;;  %v358_v38 = vmul.f32 %v346_v14, %v346_v14 }
  0xcc   : > { %1703 = vset.pattern.permute.xlu1 %v2478_v2  ;;  %v279_v52 = vpop.permute.xlu0 %278  ;;  %v469_v10 = vsub.f32 %v2030_v59, %v2102_v42  ;;  %v496_v43 = vmax.f32 %v484_v56, 0.0  ;;  %v2488_v59 = vmov 0  }
  0xcd   : > { %v294_v25 = vsub.f32 %v2128_v12, %v279_v52  ;;  %v295_v7 = vsub.f32 %v2142_v20, %v279_v52  ;;  %879 = vperm.xlu1 %1703, %v827_v57   ;;  %v349_v9 = vmax.f32 %v337_v29, 0.0  ;;  %v348_v34 = vmax.f32 %v336_v45, 0.0 }
  0xce   : > { %v438_v57 = vsub.f32 %v2128_v12, %v2096_v39  ;;  %v497_v52 = vmax.f32 %v485_v27, 0.0  ;;  %v372_v27 = vpack.c.bf16 %v2106_v48, %v2170_v17  ;;  %v476_v48 = vsub.f32 %v2165_v13, %v2042_v63 }
  0xcf   : > { %v342_v37 = vmul.f32 %v330_v54, %v294_v25  ;;  %v343_v2 = vmul.f32 %v331_v1, %v295_v7  ;;  %v2180_v3 = vpop.permute.xlu1 %551  ;;  %v361_v45 = vmul.f32 %v349_v9, %v349_v9  ;;  %v360_v14 = vmul.f32 %v348_v34, %v348_v34 }
  0xd0   : > { %v408_v32 = vpop.permute.xlu0 %407  ;;  %v486_v29 = vmul.f32 %v474_v15, %v438_v57  ;;  %v487_v7 = vmul.f32 %v475_v36, %v439_v23  ;;  %v619_v34 = vsub.f32 %v2001_v51, %v2142_v20  ;;  %v2199_v15 = vmul.f32 %v496_v43, %v496_v43 }
  0xd1   : > { %v355_v54 = vmax.f32 %v343_v2, 0.0  ;;  %v432_v1 = vsub.f32 %v2099_v40, %v408_v32  ;;  %v433_v18 = vsub.f32 %v2102_v42, %v408_v32  ;;  %1704 = vset.pattern.permute.xlu1 %v2488_v59  ;;  %v371_v56 = vpack.c.bf16 %v361_v45, %v359_v24 }
  0xd2   : > { %1142 = vperm.xlu1 %1704, %v1118_v0   ;;  %v370_v25 = vpack.c.bf16 %v360_v14, %v358_v38  ;;  %v354_v26 = vmax.f32 %v342_v37, 0.0  ;;  %v373_v32 = vpack.c.bf16 %v2108_v49, %v363_v22  ;;  %v503_v38 = vmul.f32 %v491_v5, %v491_v5 }
  0xd3   : > { %v480_v16 = vmul.f32 %v468_v50, %v432_v1  ;;  %v481_v9 = vmul.f32 %v469_v10, %v433_v18  ;;  %v367_v39 = vmul.f32 %v355_v54, %v355_v54  ;;  %1457 = vmatprep.subr.bf16.mxu1 %v371_v56  ;;  %v2201_v36 = vmul.f32 %v490_v30, %v490_v30 }
  0xd4   : > { %v592_v2 = vpop.permute.xlu1 %591  ;;  %v413_v8 = vpop.permute.xlu0 %412  ;;  %1458 = vmatpush1.bf16.msra.mxu1 %v370_v25  ;;  %v2203_v50 = vmul.f32 %v497_v52, %v497_v52  ;;  %v498_v37 = vmax.f32 %v486_v29, 0.0  ;;  %v2489_v45 = vmov 1   ;;  %v499_v49 = vmax.f32 %v487_v7, 0.0 }
  0xd5   : > { %v493_v24 = vmax.f32 %v481_v9, 0.0  ;;  %v434_v10 = vsub.f32 %v2075_v21, %v413_v8  ;;  %v435_v57 = vsub.f32 %v2072_v19, %v413_v8  ;;  %1459 = vmatprep.subr.bf16.mxu1 %v373_v32  ;;  %v366_v17 = vmul.f32 %v354_v26, %v354_v26 }
  0xd6   : > { %1705 = vset.pattern.permute.xlu1 %v2489_v45  ;;  %v492_v22 = vmax.f32 %v480_v16, 0.0  ;;  %v2490_v30 = vsub.f32 %v1978_v44, %v2075_v21  ;;  %v2491_v14 = vsub.f32 %v1978_v44, %v2072_v19  ;;  %v375_v54 = vpack.c.bf16 %v2125_v11, %v367_v39 }
  0xd7   : > { %1179 = vperm.xlu1 %1705, %v1118_v0   ;;  %v505_v5 = vmul.f32 %v493_v24, %v493_v24  ;;  %v477_v1 = vsub.f32 %v2165_v13, %v2051_v6  ;;  %v612_v18 = vsub.f32 %v592_v2, %v2099_v40  ;;  %v576_v52 = vsub.f32 %v2099_v40, %v2180_v3 }
  0xd8   : > { %v482_v43 = vmul.f32 %v2490_v30, %v434_v10  ;;  %v483_v23 = vmul.f32 %v2491_v14, %v435_v57  ;;  %v428_v8 = vpop.permute.xlu0 %427  ;;  %1460 = vmatpush1.bf16.msra.mxu1 %v372_v27  ;;  %v613_v44 = vsub.f32 %v592_v2, %v2102_v42  ;;  %v504_v11 = vmul.f32 %v492_v22, %v492_v22 }
  0xd9   : > { %v440_v16 = vsub.f32 %v2042_v63, %v428_v8  ;;  %v441_v26 = vsub.f32 %v2051_v6, %v428_v8  ;;  %v557_v0 = vpop.permute.xlu1 %556  ;;  %1461 = vmatprep.subr.bf16.mxu1 %v375_v54  ;;  %v374_v13 = vpack.c.bf16 %v2117_v4, %v366_v17  ;;  %v2227_v9 = vmul.f32 %v498_v37, %v498_v37 }
  0xda   : > { %v494_v29 = vmax.f32 %v482_v43, 0.0  ;;  %v495_v56 = vmax.f32 %v483_v23, 0.0  ;;  %v577_v39 = vsub.f32 %v2102_v42, %v2180_v3  ;;  %v515_v24 = vpack.c.bf16 %v505_v5, %v503_v38 }
  0xdb   : > { %v488_v25 = vmul.f32 %v476_v48, %v440_v16  ;;  %v489_v7 = vmul.f32 %v477_v1, %v441_v26  ;;  %1183 = vperm.xlu1 %1705, %v1944_v33   ;;  %v624_v10 = vmul.f32 %v612_v18, %v576_v52  ;;  %v829_v33 = vld [vmem:[%s2474_s1 + $0xd8] sm:$0xff]  ;;  %v511_v4 = vmul.f32 %v499_v49, %v499_v49 }
  0xdc   : > { %v507_v32 = vmul.f32 %v495_v56, %v495_v56  ;;  %v547_v27 = vpop.permute.xlu0 %546  ;;  %1462 = vmatpush1.bf16.msra.mxu1 %v374_v13  ;;  %v625_v37 = vmul.f32 %v613_v44, %v577_v39  ;;  %v506_v48 = vmul.f32 %v494_v29, %v494_v29  ;;  %v579_v17 = vsub.f32 %v2072_v19, %v557_v0 }
  0xdd   : > { %v501_v2 = vmax.f32 %v489_v7, 0.0  ;;  %v574_v57 = vsub.f32 %v2087_v28, %v547_v27  ;;  %v575_v22 = vsub.f32 %v2092_v31, %v547_v27  ;;  %1463 = vmatprep.subr.bf16.mxu1 %v515_v24  ;;  %v500_v30 = vmax.f32 %v488_v25, 0.0 }
  0xde   : > { %v596_v3 = vpop.permute.xlu1 %595  ;;  %v2492_v38 = vsub.f32 %v1989_v47, %v2087_v28  ;;  %v2493_v43 = vsub.f32 %v1989_v47, %v2092_v31  ;;  %v514_v23 = vpack.c.bf16 %v504_v11, %v2201_v36  ;;  %v517_v18 = vpack.c.bf16 %v2203_v50, %v507_v32 }
  0xdf   : > { %1706 = vset.pattern.permute.xlu1 %v2488_v59  ;;  %v513_v49 = vmul.f32 %v501_v2, %v501_v2  ;;  %v614_v8 = vsub.f32 %v596_v3, %v2075_v21  ;;  %v615_v54 = vsub.f32 %v596_v3, %v2072_v19  ;;  %v636_v16 = vmax.f32 %v624_v10, 0.0 }
  0xe0   : > { %v622_v5 = vmul.f32 %v2492_v38, %v574_v57  ;;  %v623_v14 = vmul.f32 %v2493_v43, %v575_v22  ;;  %849 = vperm.xlu1 %1706, %v829_v33   ;;  %v562_v1 = vpop.permute.xlu0 %561  ;;  %1464 = vmatpush1.bf16.msra.mxu1 %v514_v23  ;;  %v637_v44 = vmax.f32 %v625_v37, 0.0  ;;  %v578_v29 = vsub.f32 %v2075_v21, %v557_v0 }
  0xe1   : > { %v580_v52 = vsub.f32 %v2033_v60, %v562_v1  ;;  %v581_v47 = vsub.f32 %v2036_v61, %v562_v1  ;;  %v627_v36 = vmul.f32 %v615_v54, %v579_v17  ;;  %1465 = vmatprep.subr.bf16.mxu1 %v517_v18  ;;  %v516_v11 = vpack.c.bf16 %v2199_v15, %v506_v48 }
  0xe2   : > { %v635_v26 = vmax.f32 %v623_v14, 0.0  ;;  %v600_v56 = vpop.permute.xlu1 %599  ;;  %v512_v25 = vmul.f32 %v500_v30, %v500_v30  ;;  %v634_v7 = vmax.f32 %v622_v5, 0.0  ;;  %v626_v32 = vmul.f32 %v614_v8, %v578_v29 }
  0xe3   : > { %v616_v13 = vsub.f32 %v600_v56, %v2033_v60  ;;  %v617_v50 = vsub.f32 %v600_v56, %v2036_v61  ;;  %v639_v27 = vmax.f32 %v627_v36, 0.0  ;;  %v519_v10 = vpack.c.bf16 %v513_v49, %v511_v4  ;;  %v1258_v4 = vld [vmem:[%s2474_s1 + $0x150] sm:$0xff] }
  0xe4   : > { %v647_v39 = vmul.f32 %v635_v26, %v635_v26  ;;  %1707 = vset.pattern.permute.xlu1 %v2489_v45  ;;  %v567_v24 = vpop.permute.xlu0 %566  ;;  %1466 = vmatpush1.bf16.msra.mxu1 %v516_v11  ;;  %v649_v15 = vmul.f32 %v637_v44, %v637_v44  ;;  %v646_v37 = vmul.f32 %v634_v7, %v634_v7  ;;  %v638_v5 = vmax.f32 %v626_v32, 0.0 }
  0xe5   : > { %v628_v2 = vmul.f32 %v616_v13, %v580_v52  ;;  %v629_v0 = vmul.f32 %v617_v50, %v581_v47  ;;  %v582_v57 = vsub.f32 %v2128_v12, %v567_v24  ;;  %v583_v22 = vsub.f32 %v2142_v20, %v567_v24  ;;  %887 = vperm.xlu1 %1707, %v829_v33  }
  0xe6   : > { %1467 = vmatprep.subr.bf16.mxu1 %v519_v10  ;;  %v518_v30 = vpack.c.bf16 %v512_v25, %v2227_v9  ;;  %v648_v38 = vmul.f32 %v636_v16, %v636_v16  ;;  %v659_v43 = vpack.c.bf16 %v649_v15, %v647_v39  ;;  %v651_v14 = vmul.f32 %v639_v27, %v639_v27 }
  0xe7   : > { %v640_v48 = vmax.f32 %v628_v2, 0.0  ;;  %v641_v17 = vmax.f32 %v629_v0, 0.0  ;;  %v572_v3 = vpop.permute.xlu1 %571  ;;  %v2494_v49 = vsub.f32 %v2001_v51, %v2128_v12  ;;  %v631_v8 = vmul.f32 %v619_v34, %v583_v22  ;;  %v831_v0 = vld [vmem:[%s2474_s1 + $0xe8] sm:$0xff] }
  0xe8   : > { %1468 = vmatpush1.bf16.msra.mxu1 %v518_v30  ;;  %v658_v54 = vpack.c.bf16 %v648_v38, %v646_v37  ;;  %v650_v18 = vmul.f32 %v638_v5, %v638_v5  ;;  %v584_v16 = vsub.f32 %v2042_v63, %v572_v3  ;;  %v585_v26 = vsub.f32 %v2051_v6, %v572_v3  ;;  %v994_v27 = vpop.permute.xlu0 %993 }
  0xe9   : > { %v653_v23 = vmul.f32 %v641_v17, %v641_v17  ;;  %v630_v33 = vmul.f32 %v2494_v49, %v582_v57  ;;  %1708 = vset.pattern.permute.xlu1 %v2488_v59  ;;  %1469 = vmatprep.subr.bf16.mxu1 %v659_v43  ;;  %v652_v9 = vmul.f32 %v640_v48, %v640_v48  ;;  %v643_v44 = vmax.f32 %v631_v8, 0.0 }
  0xea   : > { %1266 = vperm.xlu1 %1708, %v1258_v4   ;;  %v1013_v48 = vsub.f32 %v2036_v61, %v994_v27 }
  0xeb   : > { %v661_v1 = vpack.c.bf16 %v653_v23, %v651_v14  ;;  %v642_v47 = vmax.f32 %v630_v33, 0.0  ;;  %v660_v56 = vpack.c.bf16 %v652_v9, %v650_v18  ;;  %v655_v25 = vmul.f32 %v643_v44, %v643_v44 }
  0xec   : > { %v608_v52 = vpop.permute.xlu1 %607  ;;  %1470 = vmatpush1.bf16.msra.mxu1 %v658_v54  ;;  %v691_v38 = vpop.permute.xlu0 %690  ;;  %v755_v14 = vsub.f32 %v2007_v53, %v2092_v31 }
  0xed   : > { %v620_v29 = vsub.f32 %v608_v52, %v2042_v63  ;;  %v621_v51 = vsub.f32 %v608_v52, %v2051_v6  ;;  %1471 = vmatprep.subr.bf16.mxu1 %v661_v1  ;;  %v654_v11 = vmul.f32 %v642_v47, %v642_v47  ;;  %v718_v23 = vsub.f32 %v2087_v28, %v691_v38 }
  0xee   : > { %1709 = vset.pattern.permute.xlu1 %v2489_v45  ;;  %v719_v49 = vsub.f32 %v2092_v31, %v691_v38 }
  0xef   : > { %v632_v34 = vmul.f32 %v620_v29, %v584_v16  ;;  %v633_v36 = vmul.f32 %v621_v51, %v585_v26  ;;  %1307 = vperm.xlu1 %1709, %v1258_v4   ;;  %v754_v4 = vsub.f32 %v2007_v53, %v2087_v28  ;;  %v1260_v53 = vld [vmem:[%s2474_s1 + $0x160] sm:$0xff] }
  0xf0   : > { %1472 = vmatpush1.bf16.msra.mxu1 %v660_v56  ;;  %v767_v52 = vmul.f32 %v755_v14, %v719_v49  ;;  %v1004_v38 = vpop.permute.xlu0 %1003 }
  0xf1   : > { %v644_v7 = vmax.f32 %v632_v34, 0.0  ;;  %v645_v13 = vmax.f32 %v633_v36, 0.0  ;;  %v989_v50 = vpop.permute.xlu1 %988  ;;  %v766_v26 = vmul.f32 %v754_v4, %v718_v23  ;;  %v1017_v4 = vsub.f32 %v2051_v6, %v1004_v38 }
  0xf2   : > { %v1010_v15 = vsub.f32 %v2075_v21, %v989_v50  ;;  %v1011_v37 = vsub.f32 %v2072_v19, %v989_v50  ;;  %v779_v36 = vmax.f32 %v767_v52, 0.0  ;;  %v759_v52 = vsub.f32 %v2014_v55, %v2072_v19 }
  0xf3   : > { %v656_v39 = vmul.f32 %v644_v7, %v644_v7  ;;  %v657_v32 = vmul.f32 %v645_v13, %v645_v13  ;;  %1311 = vperm.xlu1 %1709, %v1956_v35   ;;  %v1012_v35 = vsub.f32 %v2033_v60, %v994_v27  ;;  %v778_v34 = vmax.f32 %v766_v26, 0.0 }
  0xf4   : > { %v758_v26 = vsub.f32 %v2014_v55, %v2075_v21 }
  0xf5   : > { %v663_v24 = vpack.c.bf16 %v657_v32, %v655_v25  ;;  %v662_v10 = vpack.c.bf16 %v656_v39, %v654_v11 }
  0xf6   : > { %v1028_v2 = vpop.permute.xlu1 %1027 }
  0xf7   : > { %v1046_v57 = vsub.f32 %v1028_v2, %v2075_v21  ;;  %v1047_v22 = vsub.f32 %v1028_v2, %v2072_v19  ;;  %1473 = vmatprep.subr.bf16.mxu1 %v663_v24  ;;  %1710 = vset.pattern.permute.xlu1 %v2488_v59  ;;  %v790_v24 = vmul.f32 %v778_v34, %v778_v34 }
  0xf8   : > { %1474 = vmatpush1.bf16.msra.mxu1 %v662_v10  ;;  %859 = vperm.xlu1 %1710, %v831_v0   ;;  %v791_v10 = vmul.f32 %v779_v36, %v779_v36 }
  0xf9   : > { %v1058_v17 = vmul.f32 %v1046_v57, %v1010_v15  ;;  %v1059_v30 = vmul.f32 %v1047_v22, %v1011_v37 }
  0xfa   : > { %v1032_v3 = vpop.permute.xlu1 %1031 }
  0xfb   : > { %v1048_v5 = vsub.f32 %v1032_v3, %v2033_v60  ;;  %v1049_v43 = vsub.f32 %v1032_v3, %v2036_v61  ;;  %v1071_v9 = vmax.f32 %v1059_v30, 0.0  ;;  %v1070_v54 = vmax.f32 %v1058_v17, 0.0  ;;  %v971_v17 = vld [vmem:[%s2474_s1 + $0xf8] sm:$0xff] }
  0xfc   : > { %1711 = vset.pattern.permute.xlu1 %v2489_v45 }
  0xfd   : > { %v1060_v33 = vmul.f32 %v1048_v5, %v1012_v35  ;;  %v1061_v8 = vmul.f32 %v1049_v43, %v1013_v48  ;;  %895 = vperm.xlu1 %1711, %v831_v0   ;;  %v1083_v47 = vmul.f32 %v1071_v9, %v1071_v9  ;;  %v1082_v29 = vmul.f32 %v1070_v54, %v1070_v54  ;;  %v701_v9 = vpop.permute.xlu0 %700 }
  0xff   : > { %v696_v1 = vpop.permute.xlu1 %695  ;;  %v1073_v18 = vmax.f32 %v1061_v8, 0.0  ;;  %v1072_v16 = vmax.f32 %v1060_v33, 0.0 }
 0x100   : > { %v720_v7 = vsub.f32 %v2099_v40, %v696_v1  ;;  %v721_v13 = vsub.f32 %v2102_v42, %v696_v1 }
 0x101   : > { %1712 = vset.pattern.permute.xlu1 %v2488_v59  ;;  %v1085_v44 = vmul.f32 %v1073_v18, %v1073_v18  ;;  %v1084_v51 = vmul.f32 %v1072_v16, %v1072_v16 }
 0x102   : > { %1276 = vperm.xlu1 %1712, %v1260_v53  }
 0x103   : > { %v1093_v11 = vpack.c.bf16 %v1085_v44, %v1083_v47  ;;  %v1092_v25 = vpack.c.bf16 %v1084_v51, %v1082_v29  ;;  %v1262_v29 = vld [vmem:[%s2474_s1 + $0x170] sm:$0xff] }
 0x104   : > { %v736_v56 = vpop.permute.xlu1 %735 }
 0x105   : > { %v756_v50 = vsub.f32 %v736_v56, %v2099_v40  ;;  %v757_v39 = vsub.f32 %v736_v56, %v2102_v42  ;;  %1498 = vmatprep.subr.bf16.mxu0 %v1093_v11  ;;  %v2326_v11 = vld [vmem:[%s2028_s10 + $0x30] sm:$0xff] }
 0x106   : > { %1713 = vset.pattern.permute.xlu1 %v2489_v45  ;;  %1499 = vmatpush1.bf16.msra.mxu0 %v1092_v25  ;;  %v2329_v25 = vld [vmem:[%s2028_s10 + $0x38] sm:$0xff] }
 0x107   : > { %v768_v32 = vmul.f32 %v756_v50, %v720_v7  ;;  %v769_v27 = vmul.f32 %v757_v39, %v721_v13  ;;  %1315 = vperm.xlu1 %1713, %v1260_v53  }
 0x109   : > { %v780_v2 = vmax.f32 %v768_v32, 0.0  ;;  %v781_v0 = vmax.f32 %v769_v27, 0.0  ;;  %v999_v57 = vpop.permute.xlu1 %998 }
 0x10a   : > { %v1014_v5 = vsub.f32 %v2128_v12, %v999_v57  ;;  %v1015_v43 = vsub.f32 %v2142_v20, %v999_v57 }
 0x10b   : > { %v792_v22 = vmul.f32 %v780_v2, %v780_v2  ;;  %v793_v15 = vmul.f32 %v781_v0, %v781_v0  ;;  %1319 = vperm.xlu1 %1713, %v1972_v41   ;;  %v1016_v41 = vsub.f32 %v2042_v63, %v1004_v38 }
 0x10d   : > { %v803_v37 = vpack.c.bf16 %v793_v15, %v791_v10  ;;  %v802_v35 = vpack.c.bf16 %v792_v22, %v790_v24  ;;  %v2340_v15 = vld [vmem:[%s2475_s2] sm:$0xff] }
 0x10e   : > { %v1036_v48 = vpop.permute.xlu1 %1035 }
 0x10f   : > { %v1050_v3 = vsub.f32 %v1036_v48, %v2128_v12  ;;  %v1051_v30 = vsub.f32 %v1036_v48, %v2142_v20  ;;  %1475 = vmatprep.subr.bf16.mxu1 %v803_v37  ;;  %1714 = vset.pattern.permute.xlu1 %v2488_v59 }
 0x110   : > { %1476 = vmatpush1.bf16.msra.mxu1 %v802_v35  ;;  %983 = vperm.xlu1 %1714, %v971_v17  }
 0x111   : > { %v1062_v14 = vmul.f32 %v1050_v3, %v1014_v5  ;;  %v1063_v23 = vmul.f32 %v1051_v30, %v1015_v43  ;;  %v2343_v3 = vld [vmem:[%s2028_s10] sm:$0xff]  ;;  %v2346_v30 = vld [vmem:[%s2028_s10 + $0x8] sm:$0xff] }
 0x112   : > { %v1040_v49 = vpop.permute.xlu1 %1039 }
 0x113   : > { %v1052_v33 = vsub.f32 %v1040_v49, %v2042_v63  ;;  %v1053_v8 = vsub.f32 %v1040_v49, %v2051_v6  ;;  %v1074_v54 = vmax.f32 %v1062_v14, 0.0  ;;  %v1075_v1 = vmax.f32 %v1063_v23, 0.0  ;;  %v1128_v49 = vpop.permute.xlu0 %1127 }
 0x114   : > { %1716 = vset.pattern.permute.xlu1 %v2489_v45  ;;  %v722_v63 = vsub.f32 %v2075_v21, %v701_v9  ;;  %v723_v6 = vsub.f32 %v2072_v19, %v701_v9 }
 0x115   : > { %v1064_v18 = vmul.f32 %v1052_v33, %v1016_v41  ;;  %v1065_v16 = vmul.f32 %v1053_v8, %v1017_v4  ;;  %1023 = vperm.xlu1 %1716, %v971_v17   ;;  %v1086_v51 = vmul.f32 %v1074_v54, %v1074_v54  ;;  %v1087_v34 = vmul.f32 %v1075_v1, %v1075_v1 }
 0x116   : > { %v770_v55 = vmul.f32 %v758_v26, %v722_v63  ;;  %v771_v21 = vmul.f32 %v759_v52, %v723_v6  ;;  %v1153_v33 = vsub.f32 %v2102_v42, %v1128_v49  ;;  %v762_v6 = vsub.f32 %v2023_v58, %v2128_v12 }
 0x117   : > { %v706_v53 = vpop.permute.xlu1 %705  ;;  %v1076_v47 = vmax.f32 %v1064_v18, 0.0  ;;  %v1077_v44 = vmax.f32 %v1065_v16, 0.0 }
 0x118   : > { %v724_v50 = vsub.f32 %v2326_v11, %v706_v53  ;;  %v725_v39 = vsub.f32 %v2329_v25, %v706_v53  ;;  %v782_v24 = vmax.f32 %v770_v55, 0.0  ;;  %v783_v10 = vmax.f32 %v771_v21, 0.0 }
 0x119   : > { %v1088_v36 = vmul.f32 %v1076_v47, %v1076_v47  ;;  %v1089_v56 = vmul.f32 %v1077_v44, %v1077_v44  ;;  %1717 = vset.pattern.permute.xlu1 %v2488_v59  ;;  %v763_v53 = vsub.f32 %v2023_v58, %v2142_v20  ;;  %v711_v47 = vpop.permute.xlu0 %710 }
 0x11a   : > { %1286 = vperm.xlu1 %1717, %v1262_v29   ;;  %v794_v37 = vmul.f32 %v782_v24, %v782_v24  ;;  %v795_v35 = vmul.f32 %v783_v10, %v783_v10  ;;  %v726_v44 = vsub.f32 %v2128_v12, %v711_v47 }
 0x11b   : > { %v1095_v7 = vpack.c.bf16 %v1089_v56, %v1087_v34  ;;  %v1094_v13 = vpack.c.bf16 %v1088_v36, %v1086_v51 }
 0x11c   : > { %v744_v19 = vpop.permute.xlu1 %743 }
 0x11d   : > { %v760_v32 = vsub.f32 %v744_v19, %v2326_v11  ;;  %v761_v27 = vsub.f32 %v744_v19, %v2329_v25  ;;  %1500 = vmatprep.subr.bf16.mxu0 %v1095_v7  ;;  %v2366_v7 = vld [vmem:[%s2028_s10 + $0x50] sm:$0xff] }
 0x11e   : > { %1718 = vset.pattern.permute.xlu1 %v2489_v45  ;;  %1501 = vmatpush1.bf16.msra.mxu0 %v1094_v13  ;;  %v1637_v45 = vcombine.high %v2340_v15, %v2340_v15  ;;  %v2369_v13 = vld [vmem:[%s2028_s10 + $0x58] sm:$0xff] }
 0x11f   : > { %v772_v59 = vmul.f32 %v760_v32, %v724_v50  ;;  %v773_v2 = vmul.f32 %v761_v27, %v725_v39  ;;  %1323 = vperm.xlu1 %1718, %v1262_v29   ;;  %v727_v29 = vsub.f32 %v2142_v20, %v711_v47  ;;  %v774_v50 = vmul.f32 %v762_v6, %v726_v44 }
 0x120   : > { %1489 = vmatprep.mubr.bf16.mxu1 %v1637_v45  ;;  %v898_v44 = vsub.f32 %v2038_v62, %v2087_v28 }
 0x121   : > { %v784_v0 = vmax.f32 %v772_v59, 0.0  ;;  %v785_v57 = vmax.f32 %v773_v2, 0.0  ;;  %v1123_v22 = vpop.permute.xlu1 %1122  ;;  %v775_v39 = vmul.f32 %v763_v53, %v727_v29  ;;  %v786_v59 = vmax.f32 %v774_v50, 0.0 }
 0x122   : > { %v1150_v41 = vsub.f32 %v2343_v3, %v1123_v22  ;;  %v1151_v4 = vsub.f32 %v2346_v30, %v1123_v22  ;;  %v899_v29 = vsub.f32 %v2038_v62, %v2092_v31 }
 0x123   : > { %v796_v48 = vmul.f32 %v784_v0, %v784_v0  ;;  %v797_v17 = vmul.f32 %v785_v57, %v785_v57  ;;  %1327 = vperm.xlu1 %1718, %v1987_v46   ;;  %v1152_v46 = vsub.f32 %v2099_v40, %v1128_v49  ;;  %v787_v2 = vmax.f32 %v775_v39, 0.0 }
 0x125   : > { %v805_v38 = vpack.c.bf16 %v797_v17, %v795_v35  ;;  %v804_v5 = vpack.c.bf16 %v796_v48, %v794_v37  ;;  %v798_v48 = vmul.f32 %v786_v59, %v786_v59  ;;  %v799_v17 = vmul.f32 %v787_v2, %v787_v2 }
 0x126   : > { %v1164_v43 = vpop.permute.xlu1 %1163 }
 0x127   : > { %v1186_v14 = vsub.f32 %v1164_v43, %v2343_v3  ;;  %v1187_v23 = vsub.f32 %v1164_v43, %v2346_v30  ;;  %1477 = vmatprep.subr.bf16.mxu1 %v805_v38  ;;  %v2379_v43 = vld [vmem:[%s2028_s10 + $0x28] sm:$0xff] }
 0x128   : > { %1478 = vmatpush1.bf16.msra.mxu1 %v804_v5  ;;  %v2376_v5 = vld [vmem:[%s2028_s10 + $0x20] sm:$0xff] }
 0x129   : > { %v1198_v8 = vmul.f32 %v1186_v14, %v1150_v41  ;;  %v1199_v9 = vmul.f32 %v1187_v23, %v1151_v4 }
 0x12a   : > { %v1168_v54 = vpop.permute.xlu1 %1167 }
 0x12b   : > { %v1188_v1 = vsub.f32 %v1168_v54, %v2099_v40  ;;  %v1189_v18 = vsub.f32 %v1168_v54, %v2102_v42  ;;  %v1210_v16 = vmax.f32 %v1198_v8, 0.0  ;;  %v1211_v26 = vmax.f32 %v1199_v9, 0.0  ;;  %v1138_v8 = vpop.permute.xlu0 %1137 }
 0x12c   : > { %v1156_v9 = vsub.f32 %v2033_v60, %v1138_v8  ;;  %v1157_v54 = vsub.f32 %v2036_v61, %v1138_v8 }
 0x12d   : > { %v1200_v52 = vmul.f32 %v1188_v1, %v1152_v46  ;;  %v1201_v63 = vmul.f32 %v1189_v18, %v1153_v33  ;;  %v1222_v56 = vmul.f32 %v1210_v16, %v1210_v16  ;;  %v1223_v55 = vmul.f32 %v1211_v26, %v1211_v26 }
 0x12f   : > { %v1212_v51 = vmax.f32 %v1200_v52, 0.0  ;;  %v1213_v34 = vmax.f32 %v1201_v63, 0.0  ;;  %v716_v36 = vpop.permute.xlu1 %715 }
 0x130   : > { %v728_v12 = vsub.f32 %v2366_v7, %v716_v36  ;;  %v729_v20 = vsub.f32 %v2369_v13, %v716_v36 }
 0x131   : > { %v1224_v21 = vmul.f32 %v1212_v51, %v1212_v51  ;;  %v1225_v19 = vmul.f32 %v1213_v34, %v1213_v34  ;;  %v835_v51 = vpop.permute.xlu0 %834 }
 0x132   : > { %v862_v34 = vsub.f32 %v2087_v28, %v835_v51  ;;  %v863_v36 = vsub.f32 %v2092_v31, %v835_v51 }
 0x133   : > { %v1235_v32 = vpack.c.bf16 %v1225_v19, %v1223_v55  ;;  %v1234_v58 = vpack.c.bf16 %v1224_v21, %v1222_v56 }
 0x134   : > { %v752_v27 = vpop.permute.xlu1 %751  ;;  %v910_v39 = vmul.f32 %v898_v44, %v862_v34 }
 0x135   : > { %v764_v24 = vsub.f32 %v752_v27, %v2366_v7  ;;  %v765_v10 = vsub.f32 %v752_v27, %v2369_v13  ;;  %1502 = vmatprep.subr.bf16.mxu0 %v1235_v32  ;;  %v911_v32 = vmul.f32 %v899_v29, %v863_v36  ;;  %v1724_v36 = vld [vmem:[%s2028_s10 + $0x20] sm:$0xff] }
 0x136   : > { %1503 = vmatpush1.bf16.msra.mxu0 %v1234_v58 }
 0x137   : > { %v776_v0 = vmul.f32 %v764_v24, %v728_v12  ;;  %v777_v57 = vmul.f32 %v765_v10, %v729_v20  ;;  %v922_v24 = vmax.f32 %v910_v39, 0.0  ;;  %v923_v10 = vmax.f32 %v911_v32, 0.0 }
 0x139   : > { %v788_v22 = vmax.f32 %v776_v0, 0.0  ;;  %v789_v37 = vmax.f32 %v777_v57, 0.0  ;;  %v1133_v35 = vpop.permute.xlu1 %1132 }
 0x13a   : > { %v1154_v23 = vsub.f32 %v2376_v5, %v1133_v35  ;;  %v1155_v49 = vsub.f32 %v2379_v43, %v1133_v35  ;;  %v935_v35 = vmul.f32 %v923_v10, %v923_v10 }
 0x13b   : > { %v800_v45 = vmul.f32 %v788_v22, %v788_v22  ;;  %v801_v38 = vmul.f32 %v789_v37, %v789_v37  ;;  %v934_v37 = vmul.f32 %v922_v24, %v922_v24 }
 0x13d   : > { %v807_v41 = vpack.c.bf16 %v801_v38, %v799_v17  ;;  %v806_v4 = vpack.c.bf16 %v800_v45, %v798_v48  ;;  %v2400_v45 = vld [vmem:[%s2028_s10 + $0x40] sm:$0xff] }
 0x13e   : > { %v1172_v14 = vpop.permute.xlu1 %1171 }
 0x13f   : > { %v1190_v46 = vsub.f32 %v1172_v14, %v2376_v5  ;;  %v1191_v33 = vsub.f32 %v1172_v14, %v2379_v43  ;;  %1479 = vmatprep.subr.bf16.mxu1 %v807_v41 }
 0x140   : > { %1480 = vmatpush1.bf16.msra.mxu1 %v806_v4 }
 0x141   : > { %v1202_v1 = vmul.f32 %v1190_v46, %v1154_v23  ;;  %v1203_v18 = vmul.f32 %v1191_v33, %v1155_v49  ;;  %v1148_v46 = vpop.permute.xlu0 %1147 }
 0x142   : > { %v1176_v16 = vpop.permute.xlu1 %1175 }
 0x143   : > { %v1192_v26 = vsub.f32 %v1176_v16, %v2033_v60  ;;  %v1193_v52 = vsub.f32 %v1176_v16, %v2036_v61  ;;  %v1214_v63 = vmax.f32 %v1202_v1, 0.0  ;;  %v1215_v6 = vmax.f32 %v1203_v18, 0.0  ;;  %v1723_v18 = vld [vmem:[%s2028_s10 + $0x58] sm:$0xff] }
 0x144   : > { %v1161_v16 = vsub.f32 %v1723_v18, %v1148_v46 }
 0x145   : > { %v1204_v53 = vmul.f32 %v1192_v26, %v1156_v9  ;;  %v1205_v47 = vmul.f32 %v1193_v52, %v1157_v54  ;;  %v1226_v21 = vmul.f32 %v1214_v63, %v1214_v63  ;;  %v1227_v61 = vmul.f32 %v1215_v6, %v1215_v6  ;;  %v1722_v54 = vld [vmem:[%s2028_s10 + $0x50] sm:$0xff]  ;;  %v845_v44 = vpop.permute.xlu0 %844 }
 0x146   : > { %v1160_v1 = vsub.f32 %v1722_v54, %v1148_v46 }
 0x147   : > { %v1216_v56 = vmax.f32 %v1204_v53, 0.0  ;;  %v1217_v55 = vmax.f32 %v1205_v47, 0.0  ;;  %v840_v60 = vpop.permute.xlu1 %839 }
 0x148   : > { %v864_v20 = vsub.f32 %v2099_v40, %v840_v60  ;;  %v865_v62 = vsub.f32 %v2102_v42, %v840_v60  ;;  %v1725_v60 = vld [vmem:[%s2028_s10 + $0x28] sm:$0xff] }
 0x149   : > { %v1228_v19 = vmul.f32 %v1216_v56, %v1216_v56  ;;  %v1229_v50 = vmul.f32 %v1217_v55, %v1217_v55  ;;  %v2495_v56 = vld [vmem:[#allocation3_spill] sm:$0xff] }
 0x14a   : > { %v902_v55 = vsub.f32 %v2495_v56, %v1724_v36 }
 0x14b   : > { %v1237_v58 = vpack.c.bf16 %v1229_v50, %v1227_v61  ;;  %v1236_v27 = vpack.c.bf16 %v1228_v19, %v1226_v21  ;;  %v903_v21 = vsub.f32 %v2495_v56, %v1725_v60  ;;  %v866_v61 = vsub.f32 %v1724_v36, %v845_v44  ;;  %v1729_v36 = vld [vmem:[%s2028_s10 + $0x48] sm:$0xff] }
 0x14c   : > { %v880_v12 = vpop.permute.xlu1 %879  ;;  %v867_v19 = vsub.f32 %v1725_v60, %v845_v44 }
 0x14d   : > { %v900_v28 = vsub.f32 %v880_v12, %v2099_v40  ;;  %v901_v31 = vsub.f32 %v880_v12, %v2102_v42  ;;  %1504 = vmatprep.subr.bf16.mxu0 %v1237_v58  ;;  %v2403_v40 = vld [vmem:[%s2028_s10 + $0x48] sm:$0xff] }
 0x14e   : > { %1505 = vmatpush1.bf16.msra.mxu0 %v1236_v27 }
 0x14f   : > { %v912_v59 = vmul.f32 %v900_v28, %v864_v20  ;;  %v913_v2 = vmul.f32 %v901_v31, %v865_v62  ;;  %v914_v20 = vmul.f32 %v902_v55, %v866_v61  ;;  %v915_v62 = vmul.f32 %v903_v21, %v867_v19  ;;  %v2496_v61 = vld [vmem:[#allocation4_spill] sm:$0xff] }
 0x151   : > { %v924_v0 = vmax.f32 %v912_v59, 0.0  ;;  %v925_v57 = vmax.f32 %v913_v2, 0.0  ;;  %v1143_v22 = vpop.permute.xlu1 %1142  ;;  %v926_v2 = vmax.f32 %v914_v20, 0.0 }
 0x152   : > { %v1158_v4 = vsub.f32 %v2400_v45, %v1143_v22  ;;  %v1159_v14 = vsub.f32 %v2403_v40, %v1143_v22 }
 0x153   : > { %v936_v48 = vmul.f32 %v924_v0, %v924_v0  ;;  %v937_v17 = vmul.f32 %v925_v57, %v925_v57  ;;  %v927_v0 = vmax.f32 %v915_v62, 0.0 }
 0x155   : > { %v947_v42 = vpack.c.bf16 %v937_v17, %v935_v35  ;;  %v946_v38 = vpack.c.bf16 %v936_v48, %v934_v37  ;;  %v938_v17 = vmul.f32 %v926_v2, %v926_v2 }
 0x156   : > { %v1180_v41 = vpop.permute.xlu1 %1179 }
 0x157   : > { %v1194_v23 = vsub.f32 %v1180_v41, %v2400_v45  ;;  %v1195_v49 = vsub.f32 %v1180_v41, %v2403_v40  ;;  %1481 = vmatprep.subr.bf16.mxu1 %v947_v42  ;;  %v939_v42 = vmul.f32 %v927_v0, %v927_v0 }
 0x158   : > { %1482 = vmatpush1.bf16.msra.mxu1 %v946_v38 }
 0x159   : > { %v1206_v33 = vmul.f32 %v1194_v23, %v1158_v4  ;;  %v1207_v8 = vmul.f32 %v1195_v49, %v1159_v14  ;;  %v1272_v23 = vpop.permute.xlu0 %1271 }
 0x15a   : > { %v1184_v9 = vpop.permute.xlu1 %1183 }
 0x15b   : > { %v1196_v26 = vsub.f32 %v1184_v9, %v1722_v54  ;;  %v1197_v52 = vsub.f32 %v1184_v9, %v1723_v18  ;;  %v1218_v63 = vmax.f32 %v1206_v33, 0.0  ;;  %v1219_v6 = vmax.f32 %v1207_v8, 0.0 }
 0x15d   : > { %v1208_v53 = vmul.f32 %v1196_v26, %v1160_v1  ;;  %v1209_v47 = vmul.f32 %v1197_v52, %v1161_v16  ;;  %v1230_v50 = vmul.f32 %v1218_v63, %v1218_v63  ;;  %v1231_v39 = vmul.f32 %v1219_v6, %v1219_v6  ;;  %v1726_v16 = vld [vmem:[%s2028_s10 + $0x10] sm:$0xff]  ;;  %v1727_v52 = vld [vmem:[%s2028_s10 + $0x18] sm:$0xff] }
 0x15e   : > { %v1296_v26 = vsub.f32 %v1726_v16, %v1272_v23  ;;  %v1297_v63 = vsub.f32 %v1727_v52, %v1272_v23 }
 0x15f   : > { %v1220_v29 = vmax.f32 %v1208_v53, 0.0  ;;  %v1221_v51 = vmax.f32 %v1209_v47, 0.0  ;;  %v850_v34 = vpop.permute.xlu1 %849  ;;  %v855_v47 = vpop.permute.xlu0 %854 }
 0x160   : > { %v868_v31 = vsub.f32 %v2326_v11, %v850_v34  ;;  %v869_v24 = vsub.f32 %v2329_v25, %v850_v34  ;;  %v1728_v34 = vld [vmem:[%s2028_s10 + $0x40] sm:$0xff]  ;;  %v871_v56 = vsub.f32 %v1729_v36, %v855_v47 }
 0x161   : > { %v1232_v32 = vmul.f32 %v1220_v29, %v1220_v29  ;;  %v1233_v58 = vmul.f32 %v1221_v51, %v1221_v51  ;;  %v906_v19 = vsub.f32 %v2496_v61, %v1728_v34 }
 0x163   : > { %v1239_v27 = vpack.c.bf16 %v1233_v58, %v1231_v39  ;;  %v1238_v12 = vpack.c.bf16 %v1232_v32, %v1230_v50  ;;  %v907_v50 = vsub.f32 %v2496_v61, %v1729_v36 }
 0x164   : > { %v888_v28 = vpop.permute.xlu1 %887 }
 0x165   : > { %1506 = vmatprep.subr.bf16.mxu0 %v1239_v27  ;;  %v904_v10 = vsub.f32 %v888_v28, %v2326_v11  ;;  %v905_v59 = vsub.f32 %v888_v28, %v2329_v25  ;;  %v919_v20 = vmul.f32 %v907_v50, %v871_v56  ;;  %v960_v50 = vld [vmem:[%s2028_s10 + $0x10] sm:$0xff] }
 0x166   : > { %1507 = vmatpush1.bf16.msra.mxu0 %v1238_v12 }
 0x167   : > { %v916_v57 = vmul.f32 %v904_v10, %v868_v31  ;;  %v917_v22 = vmul.f32 %v905_v59, %v869_v24 }
 0x169   : > { %v928_v37 = vmax.f32 %v916_v57, 0.0  ;;  %v929_v35 = vmax.f32 %v917_v22, 0.0  ;;  %v1267_v48 = vpop.permute.xlu1 %1266  ;;  %v931_v57 = vmax.f32 %v919_v20, 0.0 }
 0x16a   : > { %v1294_v46 = vsub.f32 %v2343_v3, %v1267_v48  ;;  %v1295_v33 = vsub.f32 %v2346_v30, %v1267_v48 }
 0x16b   : > { %v940_v38 = vmul.f32 %v928_v37, %v928_v37  ;;  %v941_v41 = vmul.f32 %v929_v35, %v929_v35 }
 0x16d   : > { %v949_v4 = vpack.c.bf16 %v941_v41, %v939_v42  ;;  %v948_v14 = vpack.c.bf16 %v940_v38, %v938_v17  ;;  %v943_v38 = vmul.f32 %v931_v57, %v931_v57 }
 0x16e   : > { %v1308_v49 = vpop.permute.xlu1 %1307 }
 0x16f   : > { %v1330_v8 = vsub.f32 %v1308_v49, %v2343_v3  ;;  %v1331_v9 = vsub.f32 %v1308_v49, %v2346_v30  ;;  %1483 = vmatprep.subr.bf16.mxu1 %v949_v4  ;;  %v870_v30 = vsub.f32 %v1728_v34, %v855_v47  ;;  %v1282_v49 = vpop.permute.xlu0 %1281 }
 0x170   : > { %1484 = vmatpush1.bf16.msra.mxu1 %v948_v14 }
 0x171   : > { %v1342_v54 = vmul.f32 %v1330_v8, %v1294_v46  ;;  %v1343_v1 = vmul.f32 %v1331_v9, %v1295_v33  ;;  %v918_v12 = vmul.f32 %v906_v19, %v870_v30 }
 0x172   : > { %v1312_v18 = vpop.permute.xlu1 %1311 }
 0x173   : > { %v1332_v6 = vsub.f32 %v1312_v18, %v1726_v16  ;;  %v1333_v53 = vsub.f32 %v1312_v18, %v1727_v52  ;;  %v1354_v44 = vmax.f32 %v1342_v54, 0.0  ;;  %v1355_v29 = vmax.f32 %v1343_v1, 0.0 }
 0x174   : > { %v930_v0 = vmax.f32 %v918_v12, 0.0  ;;  %v1301_v52 = vsub.f32 %v2329_v25, %v1282_v49 }
 0x175   : > { %v1344_v51 = vmul.f32 %v1332_v6, %v1296_v26  ;;  %v1345_v3 = vmul.f32 %v1333_v53, %v1297_v63  ;;  %v1366_v39 = vmul.f32 %v1354_v44, %v1354_v44  ;;  %v1367_v32 = vmul.f32 %v1355_v29, %v1355_v29  ;;  %v979_v53 = vpop.permute.xlu0 %978  ;;  %v1730_v29 = vld [vmem:[%s2028_s10] sm:$0xff] }
 0x176   : > { %v942_v42 = vmul.f32 %v930_v0, %v930_v0  ;;  %v1300_v26 = vsub.f32 %v2326_v11, %v1282_v49 }
 0x177   : > { %v1356_v55 = vmax.f32 %v1344_v51, 0.0  ;;  %v1357_v60 = vmax.f32 %v1345_v3, 0.0  ;;  %v860_v21 = vpop.permute.xlu1 %859  ;;  %v1006_v51 = vsub.f32 %v1730_v29, %v979_v53  ;;  %v1731_v3 = vld [vmem:[%s2028_s10 + $0x8] sm:$0xff] }
 0x178   : > { %v872_v24 = vsub.f32 %v2366_v7, %v860_v21  ;;  %v873_v10 = vsub.f32 %v2369_v13, %v860_v21  ;;  %v1007_v34 = vsub.f32 %v1731_v3, %v979_v53 }
 0x179   : > { %v1368_v58 = vmul.f32 %v1356_v55, %v1356_v55  ;;  %v1369_v27 = vmul.f32 %v1357_v60, %v1357_v60  ;;  %v2497_v55 = vld [vmem:[#allocation5_spill] sm:$0xff] }
 0x17a   : > { %v1042_v60 = vsub.f32 %v2497_v55, %v1730_v29 }
 0x17b   : > { %v1379_v62 = vpack.c.bf16 %v1369_v27, %v1367_v32  ;;  %v1378_v28 = vpack.c.bf16 %v1368_v58, %v1366_v39  ;;  %v961_v39 = vld [vmem:[%s2028_s10 + $0x18] sm:$0xff] }
 0x17c   : > { %v896_v31 = vpop.permute.xlu1 %895  ;;  %v1054_v32 = vmul.f32 %v1042_v60, %v1006_v51 }
 0x17d   : > { %v908_v59 = vsub.f32 %v896_v31, %v2366_v7  ;;  %v909_v2 = vsub.f32 %v896_v31, %v2369_v13  ;;  %1508 = vmatprep.subr.bf16.mxu0 %v1379_v62 }
 0x17e   : > { %1509 = vmatpush1.bf16.msra.mxu0 %v1378_v28 }
 0x17f   : > { %v920_v22 = vmul.f32 %v908_v59, %v872_v24  ;;  %v921_v37 = vmul.f32 %v909_v2, %v873_v10  ;;  %v1066_v10 = vmax.f32 %v1054_v32, 0.0 }
 0x181   : > { %v932_v35 = vmax.f32 %v920_v22, 0.0  ;;  %v933_v48 = vmax.f32 %v921_v37, 0.0  ;;  %v1277_v17 = vpop.permute.xlu1 %1276 }
 0x182   : > { %v1298_v33 = vsub.f32 %v2376_v5, %v1277_v17  ;;  %v1299_v8 = vsub.f32 %v2379_v43, %v1277_v17 }
 0x183   : > { %v944_v41 = vmul.f32 %v932_v35, %v932_v35  ;;  %v945_v4 = vmul.f32 %v933_v48, %v933_v48  ;;  %v1078_v35 = vmul.f32 %v1066_v10, %v1066_v10 }
 0x185   : > { %v951_v14 = vpack.c.bf16 %v945_v4, %v943_v38  ;;  %v950_v23 = vpack.c.bf16 %v944_v41, %v942_v42 }
 0x186   : > { %v1316_v46 = vpop.permute.xlu1 %1315 }
 0x187   : > { %v1334_v9 = vsub.f32 %v1316_v46, %v2376_v5  ;;  %v1335_v54 = vsub.f32 %v1316_v46, %v2379_v43  ;;  %1485 = vmatprep.subr.bf16.mxu1 %v951_v14  ;;  %v1636_v14 = vcombine.low %v2340_v15, %v2340_v15 }
 0x188   : > { %1486 = vmatpush1.bf16.msra.mxu1 %v950_v23 }
 0x189   : > { %v1346_v1 = vmul.f32 %v1334_v9, %v1298_v33  ;;  %v1347_v18 = vmul.f32 %v1335_v54, %v1299_v8  ;;  %v1292_v54 = vpop.permute.xlu0 %1291 }
 0x18a   : > { %v1320_v16 = vpop.permute.xlu1 %1319 }
 0x18b   : > { %v1336_v63 = vsub.f32 %v1320_v16, %v2326_v11  ;;  %v1337_v6 = vsub.f32 %v1320_v16, %v2329_v25  ;;  %v1358_v47 = vmax.f32 %v1346_v1, 0.0  ;;  %v1359_v5 = vmax.f32 %v1347_v18, 0.0 }
 0x18c   : > { %v1043_v11 = vsub.f32 %v2497_v55, %v1731_v3  ;;  %v1304_v18 = vsub.f32 %v2366_v7, %v1292_v54  ;;  %v1305_v16 = vsub.f32 %v2369_v13, %v1292_v54 }
 0x18d   : > { %v1348_v44 = vmul.f32 %v1336_v63, %v1300_v26  ;;  %v1349_v43 = vmul.f32 %v1337_v6, %v1301_v52  ;;  %v1370_v21 = vmul.f32 %v1358_v47, %v1358_v47  ;;  %v1371_v25 = vmul.f32 %v1359_v5, %v1359_v5 }
 0x18e   : > { %v1055_v58 = vmul.f32 %v1043_v11, %v1007_v34 }
 0x18f   : > { %v1360_v30 = vmax.f32 %v1348_v44, 0.0  ;;  %v1361_v36 = vmax.f32 %v1349_v43, 0.0  ;;  %v984_v56 = vpop.permute.xlu1 %983 }
 0x190   : > { %v1008_v62 = vsub.f32 %v960_v50, %v984_v56  ;;  %v1009_v28 = vsub.f32 %v961_v39, %v984_v56  ;;  %v1067_v59 = vmax.f32 %v1055_v58, 0.0 }
 0x191   : > { %v1372_v61 = vmul.f32 %v1360_v30, %v1360_v30  ;;  %v1373_v19 = vmul.f32 %v1361_v36, %v1361_v36  ;;  %v1444_v36 = vpop.permute.xlu0 %1443 }
 0x192   : > { %v1079_v48 = vmul.f32 %v1067_v59, %v1067_v59 }
 0x193   : > { %v1381_v27 = vpack.c.bf16 %v1373_v19, %v1371_v25  ;;  %v1380_v12 = vpack.c.bf16 %v1372_v61, %v1370_v21 }
 0x194   : > { %v1024_v20 = vpop.permute.xlu1 %1023 }
 0x195   : > { %v1044_v31 = vsub.f32 %v1024_v20, %v960_v50  ;;  %v1045_v24 = vsub.f32 %v1024_v20, %v961_v39  ;;  %1510 = vmatprep.subr.bf16.mxu0 %v1381_v27 }
 0x196   : > { %1511 = vmatpush1.bf16.msra.mxu0 %v1380_v12 }
 0x197   : > { %v1056_v2 = vmul.f32 %v1044_v31, %v1008_v62  ;;  %v1057_v0 = vmul.f32 %v1045_v24, %v1009_v28 }
 0x199   : > { %v1068_v57 = vmax.f32 %v1056_v2, 0.0  ;;  %v1069_v22 = vmax.f32 %v1057_v0, 0.0  ;;  %v1287_v37 = vpop.permute.xlu1 %1286 }
 0x19a   : > { %v1302_v23 = vsub.f32 %v2400_v45, %v1287_v37  ;;  %v1303_v49 = vsub.f32 %v2403_v40, %v1287_v37 }
 0x19b   : > { %v1080_v17 = vmul.f32 %v1068_v57, %v1068_v57  ;;  %v1081_v42 = vmul.f32 %v1069_v22, %v1069_v22 }
 0x19d   : > { %v1091_v38 = vpack.c.bf16 %v1081_v42, %v1079_v48  ;;  %v1090_v41 = vpack.c.bf16 %v1080_v17, %v1078_v35 }
 0x19e   : > { %v1324_v4 = vpop.permute.xlu1 %1323 }
 0x19f   : > { %v1338_v46 = vsub.f32 %v1324_v4, %v2400_v45  ;;  %v1339_v33 = vsub.f32 %v1324_v4, %v2403_v40  ;;  %1487 = vmatprep.subr.bf16.mxu1 %v1091_v38 }
 0x1a0   : > { %1488 = vmatpush1.bf16.msra.mxu1 %v1090_v41 }
 0x1a1   : > { %v1350_v8 = vmul.f32 %v1338_v46, %v1302_v23  ;;  %v1351_v9 = vmul.f32 %v1339_v33, %v1303_v49 }
 0x1a2   : > { %v1328_v1 = vpop.permute.xlu1 %1327 }
 0x1a3   : > { %v1340_v15 = vsub.f32 %v1328_v1, %v2366_v7  ;;  %v1341_v26 = vsub.f32 %v1328_v1, %v2369_v13  ;;  %1490 = vmatmul.mubr.bf16.vlgmr.msra.gmra.mrb[0].mxu1 %v1636_v14  ;;  %v1362_v52 = vmax.f32 %v1350_v8, 0.0  ;;  %v1363_v63 = vmax.f32 %v1351_v9, 0.0  ;;  %v1721_v7 = vld [vmem:[%s2475_s2 + $0x8] ss:$0 sps:$4 sm:$0xff]  }
 0x1a5   : > { %v1352_v45 = vmul.f32 %v1340_v15, %v1304_v18  ;;  %v1353_v6 = vmul.f32 %v1341_v26, %v1305_v16  ;;  %v1374_v47 = vmul.f32 %v1362_v52, %v1362_v52  ;;  %v1375_v5 = vmul.f32 %v1363_v63, %v1363_v63 }
 0x1a7   : > { %v1364_v40 = vmax.f32 %v1352_v45, 0.0  ;;  %v1365_v53 = vmax.f32 %v1353_v6, 0.0 }
 0x1a9   : > { %v1376_v44 = vmul.f32 %v1364_v40, %v1364_v40  ;;  %v1377_v43 = vmul.f32 %v1365_v53, %v1365_v53 }
 0x1ab   : > { %v1383_v29 = vpack.c.bf16 %v1377_v43, %v1375_v5  ;;  %v1382_v51 = vpack.c.bf16 %v1376_v44, %v1374_v47 }
 0x1ad   : > { %1512 = vmatprep.subr.bf16.mxu0 %v1383_v29 }
 0x1ae   : > { %1513 = vmatpush1.bf16.msra.mxu0 %v1382_v51 }
 0x1b1   : > { %1531 = vmatmul.mubr.bf16.vlgmr.msra.gmra.mrb[0].mxu0 %v1721_v7 }
 0x276   : > { %v1491_v13 = vpop.f32.mrb[0].mxu1 }
 0x277   : > { %v1493_v3 = vpop.f32.mrb[1].mxu1  ;;  %v1492_v56 = vadd.f32 %v1491_v13, %v1444_v36 }
 0x278   : > { %v1495_v34 = vpop.f32.mrb[2].mxu1  ;;  %v1494_v55 = vadd.f32 %v1493_v3, %v1444_v36 }
 0x279   : > { %v1496_v30 = vpop.f32.mrb[3].mxu1 }
 0x284   : > { %v1532_v60 = vpop.f32.mrb[0].mxu0 }
 0x285   : > { %v1533_v11 = vadd.f32 %v1532_v60, %v1492_v56  ;;  %v1534_v21 = vpop.f32.mrb[1].mxu0 }
 0x286   : > { %v1535_v25 = vadd.f32 %v1534_v21, %v1494_v55  ;;  %v1536_v61 = vpop.f32.mrb[2].mxu0 }
 0x287   : > { %1539 = vst [vmem:[%s235_s14] sm:$0xff] %v1533_v11  ;;  %v1537_v19 = vpop.f32.mrb[3].mxu0 }
 0x288   : > { %1540 = vst [vmem:[%s235_s14 + $0x8] sm:$0xff] %v1535_v25 }
 0x289 PF: > { %s14_s17 = sadd.s32 1, %s1754_s17   ;;  %s2498_s15 = smov %s1750_s16 }
 0x28a   : > { %p11_p5 = scmp.ge.s32.totalorder %s14_s17, 4   ;;  %s2499_s16 = smov %s2501_s18 }
 0x28c   :  { %13 = sbr.rel (!%p11_p5) target bundleno = 2 (0x2), region = 66 }

</bundles_post_ra>
